<compile_context>
chip_gen: v6e
topology: v6e:2x2x1
jax: 0.10.0
libtpu: 0.0.40
codegen_flags: <defaults>
</compile_context>

<pallas_src>
import math
from functools import partial

import jax
import jax.numpy as jnp
from jax import lax
from jax.experimental import pallas as pl
from jax.experimental.pallas import tpu as pltpu

N_HEAD, K_DIM, V_DIM = 12, 64, 64          # fixed by the reference __init__
LN_EPS = 1e-5                              # PyTorch nn.LayerNorm default


# ---------------- generation-aware budgets (v5e/v6e: 128 MiB, v7x: 64 MiB) ----

def _vmem_capacity_bytes():
    try:
        return int(pltpu.get_tpu_info().vmem_capacity_bytes)
    except Exception:
        return 64 * 1024 * 1024            # conservative fallback

_VMEM_CAP = _vmem_capacity_bytes()
VMEM_LIMIT = min(100 * 1024 * 1024, max(32 * 1024 * 1024, int(_VMEM_CAP * 0.6)))
_ROW_TILE_CAP = 1024 if _VMEM_CAP >= (96 * 1024 * 1024) else 512


def _row_tile(n):
    """Largest power-of-two row tile (<= cap, >= 8) dividing n, else full n."""
    t = _ROW_TILE_CAP
    while t >= 8:
        if n % t == 0:
            return t
        t //= 2
    return n


def _seq_tile(s):
    """Query-tile size for the MHSA kernel."""
    for t in (256, 128):
        if s % t == 0:
            return t
    return s


# --------------------------- Pallas kernels ---------------------------------

def _mhsa_addnorm_kernel(h_ref, m_ref, wq_ref, bq_ref, wkv_ref, bkv_ref,
                         wo_ref, bo_ref, g_ref, beta_ref, o_ref, kv_ref,
                         *, tq, single_q_tile):
    """One (batch, q-tile) step: QKV proj + all heads + fused W_o + Add&LN.

    kv_ref is a persistent VMEM scratch holding [K | V] for the whole sequence
    of the current batch element; it is (re)computed only when qi == 0.
    """
    qi = pl.program_id(1)
    hk = N_HEAD * K_DIM
    m = m_ref[0]                                            # (1, S) float mask

    @pl.when(qi == 0)
    def _():
        # K/V projection once per batch element (lane-dense (E, 1536) matmul).
        kv_ref[...] = jnp.dot(h_ref[0], wkv_ref[...],
                              preferred_element_type=jnp.float32) + bkv_ref[...]

    if single_q_tile:
        h_q = h_ref[0]                                      # (S, E)
    else:
        q_start = pl.multiple_of(qi * tq, tq)
        h_q = h_ref[0, pl.ds(q_start, tq), :]               # (tq, E)

    # Q projection for this query tile; 1/sqrt(k_dim) already folded into wq/bq.
    q_all = jnp.dot(h_q, wq_ref[...],
                    preferred_element_type=jnp.float32) + bq_ref[...]   # (tq, 768)

    e = o_ref.shape[2]
    o_acc = jnp.zeros((tq, e), jnp.float32)
    # TODO(synk): process heads in 128-lane-aligned pairs (batched dot_general)
    # to avoid the 64-wide per-head lane slices below.
    # TODO(synk): for very long S on v7x, tile the KV axis with an online-softmax
    # accumulator instead of holding full-S K/V + (tq, S) scores.
    for hd in range(N_HEAD):
        qh = q_all[:, hd * K_DIM:(hd + 1) * K_DIM]                      # (tq, 64)
        kh = kv_ref[:, hd * K_DIM:(hd + 1) * K_DIM]                     # (S, 64)
        vh = kv_ref[:, hk + hd * V_DIM:hk + (hd + 1) * V_DIM]           # (S, 64)
        # q @ k^T without materializing a transpose.
        s = lax.dot_general(qh, kh, (((1,), (1,)), ((), ())),
                            preferred_element_type=jnp.float32)         # (tq, S)
        # masked_softmax semantics from the reference (mask multiplies logits).
        masked = s * m
        mx = jnp.max(masked, axis=-1, keepdims=True)
        ex = jnp.exp(masked - mx)
        mex = ex * m
        ssum = jnp.sum(mex, axis=-1, keepdims=True)
        ssum = ssum + (ssum == 0.0).astype(jnp.float32)     # fully-masked guard
        attn = mex / ssum
        head_o = jnp.dot(attn, vh, preferred_element_type=jnp.float32)  # (tq, 64)
        # Per-head accumulate into a lane-dense (tq, E) accumulator (no concat).
        o_acc = o_acc + jnp.dot(head_o, wo_ref[hd * V_DIM:(hd + 1) * V_DIM, :],
                                preferred_element_type=jnp.float32)

    # Fused epilogue: out bias + residual + LayerNorm, written in final layout.
    x = o_acc + bo_ref[...] + h_q
    mean = jnp.mean(x, axis=-1, keepdims=True)
    var = jnp.mean((x - mean) ** 2, axis=-1, keepdims=True)
    y = (x - mean) * lax.rsqrt(var + LN_EPS)
    o_ref[0] = y * g_ref[...] + beta_ref[...]


def _ffn_addnorm_kernel(x_ref, w_ref, b_ref, g_ref, beta_ref, o_ref):
    """out = LayerNorm(x + tanh(x @ w + b)) — fused encoder-layer stand-in."""
    x = x_ref[...]
    y = jnp.tanh(jnp.dot(x, w_ref[...],
                         preferred_element_type=jnp.float32) + b_ref[...])
    z = x + y
    mean = jnp.mean(z, axis=-1, keepdims=True)
    var = jnp.mean((z - mean) ** 2, axis=-1, keepdims=True)
    o_ref[...] = (z - mean) * lax.rsqrt(var + LN_EPS) * g_ref[...] + beta_ref[...]


def _masked_mean_kernel(h_ref, m_ref, o_ref):
    """Masked mean over the sequence axis via a lane-dense (1,S) @ (S,E) matmul."""
    m = m_ref[0]                                            # (1, S)
    num = jnp.dot(m, h_ref[0], preferred_element_type=jnp.float32)   # (1, E)
    den = jnp.sum(m, axis=-1, keepdims=True)                # (1, 1); no guard,
    o_ref[0] = num / den                                    # matches reference


# --------------------------- kernel wrappers ---------------------------------

# TODO(synk): mark the constant weight/bias BlockSpecs below with
# pipeline_mode=pl.Buffered(1) once single-buffered constants are verified on
# the target jaxlib (saves ~half the weight VMEM on v7x).

def mhsa_addnorm_pallas(p, ln_g, ln_b, h, mask_f):
    """LayerNorm(h + MHSA(h, mask)) in one kernel (dropout is eval-mode identity)."""
    b, s, e = h.shape
    hk = N_HEAD * K_DIM
    tq = _seq_tile(s)
    nq = s // tq
    mask3 = mask_f[:, None, :]                              # (B, 1, S), lane-dense
    return pl.pallas_call(
        partial(_mhsa_addnorm_kernel, tq=tq, single_q_tile=(nq == 1)),
        out_shape=jax.ShapeDtypeStruct((b, s, e), jnp.float32),
        grid=(b, nq),
        in_specs=[
            pl.BlockSpec((1, s, e), lambda bi, qi: (bi, 0, 0)),   # h (resident per b)
            pl.BlockSpec((1, 1, s), lambda bi, qi: (bi, 0, 0)),   # mask
            pl.BlockSpec((e, hk), lambda bi, qi: (0, 0)),         # wq (scaled)
            pl.BlockSpec((1, hk), lambda bi, qi: (0, 0)),         # bq (scaled)
            pl.BlockSpec((e, 2 * hk), lambda bi, qi: (0, 0)),     # wkv
            pl.BlockSpec((1, 2 * hk), lambda bi, qi: (0, 0)),     # bkv
            pl.BlockSpec((hk, e), lambda bi, qi: (0, 0)),         # wo
            pl.BlockSpec((1, e), lambda bi, qi: (0, 0)),          # bo
            pl.BlockSpec((1, e), lambda bi, qi: (0, 0)),          # ln gamma
            pl.BlockSpec((1, e), lambda bi, qi: (0, 0)),          # ln beta
        ],
        out_specs=pl.BlockSpec((1, tq, e), lambda bi, qi: (bi, qi, 0)),
        scratch_shapes=[pltpu.VMEM((s, 2 * hk), jnp.float32)],    # K|V per batch
        compiler_params=pltpu.CompilerParams(
            # qi must stay on one core (kv scratch filled at qi==0).
            dimension_semantics=("parallel", "arbitrary"),
            vmem_limit_bytes=VMEM_LIMIT),
    )(h, mask3, p["wq"], p["bq"], p["wkv"], p["bkv"], p["wo"], p["bo"],
      ln_g, ln_b)


def ffn_addnorm_pallas(lp, h):
    b, s, e = h.shape
    n = b * s
    rt = _row_tile(n)
    out = pl.pallas_call(
        _ffn_addnorm_kernel,
        out_shape=jax.ShapeDtypeStruct((n, e), jnp.float32),
        grid=(n // rt,),
        in_specs=[
            pl.BlockSpec((rt, e), lambda i: (i, 0)),
            pl.BlockSpec((e, e), lambda i: (0, 0)),
            pl.BlockSpec((1, e), lambda i: (0, 0)),
            pl.BlockSpec((1, e), lambda i: (0, 0)),
            pl.BlockSpec((1, e), lambda i: (0, 0)),
        ],
        out_specs=pl.BlockSpec((rt, e), lambda i: (i, 0)),
        compiler_params=pltpu.CompilerParams(
            dimension_semantics=("parallel",),
            vmem_limit_bytes=VMEM_LIMIT),
    )(h.reshape(n, e), lp["w"], lp["b"], lp["ln_g"], lp["ln_b"])
    return out.reshape(b, s, e)


def masked_mean_pallas(h, mask_f):
    b, s, e = h.shape
    out = pl.pallas_call(
        _masked_mean_kernel,
        out_shape=jax.ShapeDtypeStruct((b, 1, e), jnp.float32),
        grid=(b,),
        in_specs=[
            pl.BlockSpec((1, s, e), lambda i: (i, 0, 0)),
            pl.BlockSpec((1, 1, s), lambda i: (i, 0, 0)),
        ],
        out_specs=pl.BlockSpec((1, 1, e), lambda i: (i, 0, 0)),
        compiler_params=pltpu.CompilerParams(
            dimension_semantics=("parallel",),
            vmem_limit_bytes=VMEM_LIMIT),
    )(h, mask_f[:, None, :])
    return out.reshape(b, e)


# --------------------------- model components --------------------------------
# Tiny tail MLPs (2E->128->3 and E->128->1) stay in plain XLA per the perf
# review (dout < 128 masked stores + per-call overhead dominate as kernels).

def embedding_generator_fwd(p, h, mask_f, mixup_indices, eps):
    h2 = mhsa_addnorm_pallas(p["mhsa"], p["ln_g"], p["ln_b"], h, mask_f)
    sent = masked_mean_pallas(h2, mask_f)                             # (B, E)
    mix_sent = jnp.concatenate([sent, sent[mixup_indices]], axis=1)   # (B, 2E)
    z = jnp.tanh(mix_sent @ p["w1"] + p["b1"])
    z = z @ p["w2"] + p["b2"]                                         # (B, 3)
    out = jax.nn.softmax(z, axis=-1)       # nn.Softmax() on 2-D input -> dim=1
    return out[:, 1] * eps + out[:, 0]                                # gamma (B,)


def manifold_discriminator_fwd(p, h, mask_f):
    h2 = mhsa_addnorm_pallas(p["mhsa"], p["ln_g"], p["ln_b"], h, mask_f)
    sent = masked_mean_pallas(h2, mask_f)
    z = jnp.tanh(sent @ p["w1"] + p["b1"])
    return z @ p["w2"] + p["b2"]                                      # (B, 1) logits


def bce_with_logits(x, z):
    return jnp.mean(jnp.maximum(x, 0.0) - x * z + jnp.log1p(jnp.exp(-jnp.abs(x))))


# ---- synthetic deterministic embedding_model stand-in ----
# TODO(synk): the real `embedding_model` is external to the reference code;
# this stand-in provides embed_dim / forward_embedding / encoder / forward_layer.

def forward_embedding(ep, input_ids):
    return ep["emb_table"][input_ids]                                 # (B, S, E)


def forward_layer(lp, h, mask_f):
    return ffn_addnorm_pallas(lp, h)        # fused linear+tanh + residual + LN


def oommix_forward(params, input_ids, attention_mask, mixup_indices=None,
                   eps=None, g_layer=0, d_layer=0):
    assert g_layer <= d_layer               # mirrors the reference __init__ assert
    h = forward_embedding(params["embed"], input_ids)
    mask_f = attention_mask.astype(jnp.float32)
    mix_h, gamma, intr_loss = None, None, None

    for layer_idx, lp in enumerate(params["embed"]["encoder"]):
        if mixup_indices is not None:
            if layer_idx == g_layer:
                gamma = embedding_generator_fwd(params["gen"], h, mask_f,
                                                mixup_indices, eps)
                mix_h = (gamma[:, None, None] * h
                         + (1.0 - gamma)[:, None, None] * h[mixup_indices])
                both = (attention_mask[:, :, None]
                        & attention_mask[mixup_indices][:, :, None])
                mix_h = jnp.where(both, mix_h, h)
            if layer_idx == d_layer:
                pos = manifold_discriminator_fwd(params["disc"], h, mask_f)
                neg = manifold_discriminator_fwd(params["disc"], mix_h, mask_f)
                out = jnp.concatenate([pos, neg], axis=0)
                label = jnp.concatenate([jnp.ones_like(pos),
                                         jnp.zeros_like(neg)], axis=0)
                intr_loss = bce_with_logits(out, label)
            if layer_idx >= g_layer:
                mix_h = forward_layer(lp, mix_h, mask_f)
        # h passes through every encoder layer (grad/no-grad is a training-time
        # distinction only; forward numerics are identical)
        h = forward_layer(lp, h, mask_f)

    if mixup_indices is not None and 12 == d_layer:                   # mirrors literal 12
        pos = manifold_discriminator_fwd(params["disc"], h, mask_f)
        neg = manifold_discriminator_fwd(params["disc"], mix_h, mask_f)
        out = jnp.concatenate([pos, neg], axis=0)
        label = jnp.concatenate([jnp.ones_like(pos), jnp.zeros_like(neg)], axis=0)
        intr_loss = bce_with_logits(out, label)

    if mixup_indices is None:
        return h
    return h, mix_h, gamma, intr_loss


# --------------------------- parameter init ----------------------------------
# Parameters are stored in kernel-ready layout: 1/sqrt(k_dim) folded into the
# Q projection, K|V weights fused, biases as (1, dout), LayerNorm as (1, E).

def init_params(key, vocab, embed_dim, n_layers):
    keys = iter(jax.random.split(key, 64))

    def dense(din, dout):
        w = 0.02 * jax.random.normal(next(keys), (din, dout), jnp.float32)
        return w, jnp.zeros((1, dout), jnp.float32)

    def mhsa_params(e):
        wq, bq = dense(e, N_HEAD * K_DIM)
        wk, bk = dense(e, N_HEAD * K_DIM)
        wv, bv = dense(e, N_HEAD * V_DIM)
        wo, bo = dense(N_HEAD * V_DIM, e)
        inv_sqrt_k = jnp.float32(1.0 / math.sqrt(K_DIM))
        return dict(
            wq=wq * inv_sqrt_k, bq=bq * inv_sqrt_k,        # scale folded at init
            wkv=jnp.concatenate([wk, wv], axis=1),         # (E, 2*H*K) fused K|V
            bkv=jnp.concatenate([bk, bv], axis=1),         # (1, 2*H*K)
            wo=wo, bo=bo)

    gen = dict(mhsa=mhsa_params(embed_dim),
               ln_g=jnp.ones((1, embed_dim), jnp.float32),
               ln_b=jnp.zeros((1, embed_dim), jnp.float32))
    gen["w1"], gen["b1"] = dense(2 * embed_dim, 128)
    gen["w2"], gen["b2"] = dense(128, 3)

    disc = dict(mhsa=mhsa_params(embed_dim),
                ln_g=jnp.ones((1, embed_dim), jnp.float32),
                ln_b=jnp.zeros((1, embed_dim), jnp.float32))
    disc["w1"], disc["b1"] = dense(embed_dim, 128)
    disc["w2"], disc["b2"] = dense(128, 1)

    encoder = []
    for _ in range(n_layers):
        w, b = dense(embed_dim, embed_dim)
        encoder.append(dict(w=w, b=b,
                            ln_g=jnp.ones((1, embed_dim), jnp.float32),
                            ln_b=jnp.zeros((1, embed_dim), jnp.float32)))

    embed = dict(
        emb_table=0.02 * jax.random.normal(next(keys), (vocab, embed_dim),
                                           jnp.float32),
        encoder=encoder)
    return dict(embed=embed, gen=gen, disc=disc)


# --------------------------- entry point --------------------------------------

if __name__ == "__main__":
    B, S, E, VOCAB, N_LAYERS = 2, 8, 32, 50, 2
    key = jax.random.PRNGKey(0)
    pkey, ikey = jax.random.split(key)

    params = init_params(pkey, VOCAB, E, N_LAYERS)
    input_ids = jax.random.randint(ikey, (B, S), 0, VOCAB)
    attention_mask = jnp.array(
        [[True] * S, [True] * 5 + [False] * (S - 5)], dtype=bool)
    mixup_indices = jnp.array([1, 0], dtype=jnp.int32)
    eps = jnp.float32(0.3)

    h, mix_h, gamma, intr_loss = oommix_forward(
        params, input_ids, attention_mask, mixup_indices, eps)
    jax.block_until_ready((h, mix_h, gamma, intr_loss))
    print("KERNEL_OK")
</pallas_src>

<mosaic_0001>
module attributes {stable_mosaic.version = 11 : i64} {
  func.func @_mhsa_addnorm_kernel(%arg0: i32, %arg1: i32, %arg2: memref<1x8x32xf32, #tpu.memory_space<vmem>>, %arg3: memref<1x1x8xf32, #tpu.memory_space<vmem>>, %arg4: memref<32x768xf32, #tpu.memory_space<vmem>>, %arg5: memref<1x768xf32, #tpu.memory_space<vmem>>, %arg6: memref<32x1536xf32, #tpu.memory_space<vmem>>, %arg7: memref<1x1536xf32, #tpu.memory_space<vmem>>, %arg8: memref<768x32xf32, #tpu.memory_space<vmem>>, %arg9: memref<1x32xf32, #tpu.memory_space<vmem>>, %arg10: memref<1x32xf32, #tpu.memory_space<vmem>>, %arg11: memref<1x32xf32, #tpu.memory_space<vmem>>, %arg12: memref<1x8x32xf32, #tpu.memory_space<vmem>>, %arg13: memref<8x1536xf32, #tpu.memory_space<vmem>>) attributes {dimension_semantics = [#tpu.dimension_semantics<parallel>, #tpu.dimension_semantics<arbitrary>], iteration_bounds = array<i64: 2, 1>, scalar_prefetch = 0 : i64, scratch_operands = 1 : i64, tpu.core_type = #tpu.core_type<tc>, window_params = [{transform_indices = @transform_0, window_bounds = array<i64: 1, 8, 32>}, {transform_indices = @transform_1, window_bounds = array<i64: 1, 1, 8>}, {pipeline_mode = #tpu.pipeline_mode<synchronous>, transform_indices = @transform_2, window_bounds = array<i64: 32, 768>}, {pipeline_mode = #tpu.pipeline_mode<synchronous>, transform_indices = @transform_3, window_bounds = array<i64: 1, 768>}, {pipeline_mode = #tpu.pipeline_mode<synchronous>, transform_indices = @transform_4, window_bounds = array<i64: 32, 1536>}, {pipeline_mode = #tpu.pipeline_mode<synchronous>, transform_indices = @transform_5, window_bounds = array<i64: 1, 1536>}, {pipeline_mode = #tpu.pipeline_mode<synchronous>, transform_indices = @transform_6, window_bounds = array<i64: 768, 32>}, {pipeline_mode = #tpu.pipeline_mode<synchronous>, transform_indices = @transform_7, window_bounds = array<i64: 1, 32>}, {pipeline_mode = #tpu.pipeline_mode<synchronous>, transform_indices = @transform_8, window_bounds = array<i64: 1, 32>}, {pipeline_mode = #tpu.pipeline_mode<synchronous>, transform_indices = @transform_9, window_bounds = array<i64: 1, 32>}, {transform_indices = @transform_10, window_bounds = array<i64: 1, 8, 32>}]} {
    %c0 = arith.constant 0 : index
    %c0_0 = arith.constant 0 : index
    %c0_1 = arith.constant 0 : index
    %0 = vector.load %arg3[%c0, %c0_0, %c0_1] : memref<1x1x8xf32, #tpu.memory_space<vmem>>, vector<1x1x8xf32>
    %1 = vector.shape_cast %0 : vector<1x1x8xf32> to vector<1x8xf32>
    %c0_i32 = arith.constant 0 : i32
    %2 = arith.cmpi eq, %arg1, %c0_i32 : i32
    %3 = arith.extui %2 : i1 to i32
    %c0_i32_2 = arith.constant 0 : i32
    %4 = arith.cmpi ne, %3, %c0_i32_2 : i32
    scf.if %4 {
      %c0_146 = arith.constant 0 : index
      %c0_147 = arith.constant 0 : index
      %c0_148 = arith.constant 0 : index
      %356 = vector.load %arg2[%c0_146, %c0_147, %c0_148] : memref<1x8x32xf32, #tpu.memory_space<vmem>>, vector<1x8x32xf32>
      %357 = vector.shape_cast %356 : vector<1x8x32xf32> to vector<8x32xf32>
      %c0_149 = arith.constant 0 : index
      %c0_150 = arith.constant 0 : index
      %358 = vector.load %arg6[%c0_149, %c0_150] : memref<32x1536xf32, #tpu.memory_space<vmem>>, vector<32x1536xf32>
      %cst_151 = arith.constant dense<0.000000e+00> : vector<8x1536xf32>
      %359 = tpu.matmul %357, %358, %cst_151 {dimension_numbers = #tpu.dot_dimension_numbers<[1], [0], [0], [1], [0, 0, 1, 1], [], []>} : vector<8x32xf32>, vector<32x1536xf32>, vector<8x1536xf32> -> vector<8x1536xf32>
      %c0_152 = arith.constant 0 : index
      %c0_153 = arith.constant 0 : index
      %360 = vector.load %arg7[%c0_152, %c0_153] : memref<1x1536xf32, #tpu.memory_space<vmem>>, vector<1x1536xf32>
      %361 = vector.broadcast %360 : vector<1x1536xf32> to vector<8x1536xf32>
      %362 = arith.addf %359, %361 : vector<8x1536xf32>
      %c0_154 = arith.constant 0 : index
      %c0_155 = arith.constant 0 : index
      %363 = vector.load %arg13[%c0_154, %c0_155] : memref<8x1536xf32, #tpu.memory_space<vmem>>, vector<8x1536xf32>
      tpu.vector_store %arg13[%c0_154, %c0_155], %362 {strides = array<i32>} : memref<8x1536xf32, #tpu.memory_space<vmem>>, vector<8x1536xf32>,
    } else {
    }
    %c0_3 = arith.constant 0 : index
    %c0_4 = arith.constant 0 : index
    %c0_5 = arith.constant 0 : index
    %5 = vector.load %arg2[%c0_3, %c0_4, %c0_5] : memref<1x8x32xf32, #tpu.memory_space<vmem>>, vector<1x8x32xf32>
    %6 = vector.shape_cast %5 : vector<1x8x32xf32> to vector<8x32xf32>
    %c0_6 = arith.constant 0 : index
    %c0_7 = arith.constant 0 : index
    %7 = vector.load %arg4[%c0_6, %c0_7] : memref<32x768xf32, #tpu.memory_space<vmem>>, vector<32x768xf32>
    %cst = arith.constant dense<0.000000e+00> : vector<8x768xf32>
    %8 = tpu.matmul %6, %7, %cst {dimension_numbers = #tpu.dot_dimension_numbers<[1], [0], [0], [1], [0, 0, 1, 1], [], []>} : vector<8x32xf32>, vector<32x768xf32>, vector<8x768xf32> -> vector<8x768xf32>
    %c0_8 = arith.constant 0 : index
    %c0_9 = arith.constant 0 : index
    %9 = vector.load %arg5[%c0_8, %c0_9] : memref<1x768xf32, #tpu.memory_space<vmem>>, vector<1x768xf32>
    %10 = vector.broadcast %9 : vector<1x768xf32> to vector<8x768xf32>
    %11 = arith.addf %8, %10 : vector<8x768xf32>
    %cst_10 = arith.constant 0.000000e+00 : f32
    %12 = vector.broadcast %cst_10 : f32 to vector<8x32xf32>
    %13 = vector.extract_strided_slice %11 {offsets = [0, 0], sizes = [8, 64], strides = [1, 1]} : vector<8x768xf32> to vector<8x64xf32>
    %c0_11 = arith.constant 0 : index
    %c0_12 = arith.constant 0 : index
    %14 = vector.load %arg13[%c0_11, %c0_12] : memref<8x1536xf32, #tpu.memory_space<vmem>>, vector<8x64xf32>
    %c0_13 = arith.constant 0 : index
    %c768 = arith.constant 768 : index
    %15 = vector.load %arg13[%c0_13, %c768] : memref<8x1536xf32, #tpu.memory_space<vmem>>, vector<8x64xf32>
    %cst_14 = arith.constant dense<0.000000e+00> : vector<8x8xf32>
    %16 = tpu.matmul %13, %14, %cst_14 {dimension_numbers = #tpu.dot_dimension_numbers<[1], [1], [0], [0], [0, 0, 1, 0], [], []>} : vector<8x64xf32>, vector<8x64xf32>, vector<8x8xf32> -> vector<8x8xf32>
    %17 = vector.broadcast %1 : vector<1x8xf32> to vector<8x8xf32>
    %18 = arith.mulf %16, %17 : vector<8x8xf32>
    %cst_15 = arith.constant dense<0xFF800000> : vector<8xf32>
    %19 = vector.multi_reduction <maximumf>, %18, %cst_15 [1] : vector<8x8xf32> to vector<8xf32>
    %20 = vector.shape_cast %19 : vector<8xf32> to vector<8x1xf32>
    %21 = vector.broadcast %20 : vector<8x1xf32> to vector<8x8xf32>
    %22 = arith.subf %18, %21 : vector<8x8xf32>
    %23 = math.exp %22 : vector<8x8xf32>
    %24 = vector.broadcast %1 : vector<1x8xf32> to vector<8x8xf32>
    %25 = arith.mulf %23, %24 : vector<8x8xf32>
    %cst_16 = arith.constant dense<0.000000e+00> : vector<8xf32>
    %26 = vector.multi_reduction <add>, %25, %cst_16 [1] : vector<8x8xf32> to vector<8xf32>
    %27 = vector.shape_cast %26 : vector<8xf32> to vector<8x1xf32>
    %cst_17 = arith.constant 0.000000e+00 : f32
    %28 = vector.broadcast %cst_17 : f32 to vector<8x1xf32>
    %29 = arith.cmpf oeq, %27, %28 : vector<8x1xf32>
    %30 = arith.extui %29 : vector<8x1xi1> to vector<8x1xi32>
    %31 = arith.sitofp %30 : vector<8x1xi32> to vector<8x1xf32>
    %32 = arith.addf %27, %31 : vector<8x1xf32>
    %33 = vector.broadcast %32 : vector<8x1xf32> to vector<8x8xf32>
    %34 = arith.divf %25, %33 : vector<8x8xf32>
    %cst_18 = arith.constant dense<0.000000e+00> : vector<8x64xf32>
    %35 = tpu.matmul %34, %15, %cst_18 {dimension_numbers = #tpu.dot_dimension_numbers<[1], [0], [0], [1], [0, 0, 1, 1], [], []>} : vector<8x8xf32>, vector<8x64xf32>, vector<8x64xf32> -> vector<8x64xf32>
    %c0_19 = arith.constant 0 : index
    %c0_20 = arith.constant 0 : index
    %36 = vector.load %arg8[%c0_19, %c0_20] : memref<768x32xf32, #tpu.memory_space<vmem>>, vector<64x32xf32>
    %cst_21 = arith.constant dense<0.000000e+00> : vector<8x32xf32>
    %37 = tpu.matmul %35, %36, %cst_21 {dimension_numbers = #tpu.dot_dimension_numbers<[1], [0], [0], [1], [0, 0, 1, 1], [], []>} : vector<8x64xf32>, vector<64x32xf32>, vector<8x32xf32> -> vector<8x32xf32>
    %38 = arith.addf %12, %37 : vector<8x32xf32>
    %39 = vector.extract_strided_slice %11 {offsets = [0, 64], sizes = [8, 64], strides = [1, 1]} : vector<8x768xf32> to vector<8x64xf32>
    %c0_22 = arith.constant 0 : index
    %c64 = arith.constant 64 : index
    %40 = vector.load %arg13[%c0_22, %c64] : memref<8x1536xf32, #tpu.memory_space<vmem>>, vector<8x64xf32>
    %c0_23 = arith.constant 0 : index
    %c832 = arith.constant 832 : index
    %41 = vector.load %arg13[%c0_23, %c832] : memref<8x1536xf32, #tpu.memory_space<vmem>>, vector<8x64xf32>
    %cst_24 = arith.constant dense<0.000000e+00> : vector<8x8xf32>
    %42 = tpu.matmul %39, %40, %cst_24 {dimension_numbers = #tpu.dot_dimension_numbers<[1], [1], [0], [0], [0, 0, 1, 0], [], []>} : vector<8x64xf32>, vector<8x64xf32>, vector<8x8xf32> -> vector<8x8xf32>
    %43 = vector.broadcast %1 : vector<1x8xf32> to vector<8x8xf32>
    %44 = arith.mulf %42, %43 : vector<8x8xf32>
    %cst_25 = arith.constant dense<0xFF800000> : vector<8xf32>
    %45 = vector.multi_reduction <maximumf>, %44, %cst_25 [1] : vector<8x8xf32> to vector<8xf32>
    %46 = vector.shape_cast %45 : vector<8xf32> to vector<8x1xf32>
    %47 = vector.broadcast %46 : vector<8x1xf32> to vector<8x8xf32>
    %48 = arith.subf %44, %47 : vector<8x8xf32>
    %49 = math.exp %48 : vector<8x8xf32>
    %50 = vector.broadcast %1 : vector<1x8xf32> to vector<8x8xf32>
    %51 = arith.mulf %49, %50 : vector<8x8xf32>
    %cst_26 = arith.constant dense<0.000000e+00> : vector<8xf32>
    %52 = vector.multi_reduction <add>, %51, %cst_26 [1] : vector<8x8xf32> to vector<8xf32>
    %53 = vector.shape_cast %52 : vector<8xf32> to vector<8x1xf32>
    %cst_27 = arith.constant 0.000000e+00 : f32
    %54 = vector.broadcast %cst_27 : f32 to vector<8x1xf32>
    %55 = arith.cmpf oeq, %53, %54 : vector<8x1xf32>
    %56 = arith.extui %55 : vector<8x1xi1> to vector<8x1xi32>
    %57 = arith.sitofp %56 : vector<8x1xi32> to vector<8x1xf32>
    %58 = arith.addf %53, %57 : vector<8x1xf32>
    %59 = vector.broadcast %58 : vector<8x1xf32> to vector<8x8xf32>
    %60 = arith.divf %51, %59 : vector<8x8xf32>
    %cst_28 = arith.constant dense<0.000000e+00> : vector<8x64xf32>
    %61 = tpu.matmul %60, %41, %cst_28 {dimension_numbers = #tpu.dot_dimension_numbers<[1], [0], [0], [1], [0, 0, 1, 1], [], []>} : vector<8x8xf32>, vector<8x64xf32>, vector<8x64xf32> -> vector<8x64xf32>
    %c64_29 = arith.constant 64 : index
    %c0_30 = arith.constant 0 : index
    %62 = vector.load %arg8[%c64_29, %c0_30] : memref<768x32xf32, #tpu.memory_space<vmem>>, vector<64x32xf32>
    %cst_31 = arith.constant dense<0.000000e+00> : vector<8x32xf32>
    %63 = tpu.matmul %61, %62, %cst_31 {dimension_numbers = #tpu.dot_dimension_numbers<[1], [0], [0], [1], [0, 0, 1, 1], [], []>} : vector<8x64xf32>, vector<64x32xf32>, vector<8x32xf32> -> vector<8x32xf32>
    %64 = arith.addf %38, %63 : vector<8x32xf32>
    %65 = vector.extract_strided_slice %11 {offsets = [0, 128], sizes = [8, 64], strides = [1, 1]} : vector<8x768xf32> to vector<8x64xf32>
    %c0_32 = arith.constant 0 : index
    %c128 = arith.constant 128 : index
    %66 = vector.load %arg13[%c0_32, %c128] : memref<8x1536xf32, #tpu.memory_space<vmem>>, vector<8x64xf32>
    %c0_33 = arith.constant 0 : index
    %c896 = arith.constant 896 : index
    %67 = vector.load %arg13[%c0_33, %c896] : memref<8x1536xf32, #tpu.memory_space<vmem>>, vector<8x64xf32>
    %cst_34 = arith.constant dense<0.000000e+00> : vector<8x8xf32>
    %68 = tpu.matmul %65, %66, %cst_34 {dimension_numbers = #tpu.dot_dimension_numbers<[1], [1], [0], [0], [0, 0, 1, 0], [], []>} : vector<8x64xf32>, vector<8x64xf32>, vector<8x8xf32> -> vector<8x8xf32>
    %69 = vector.broadcast %1 : vector<1x8xf32> to vector<8x8xf32>
    %70 = arith.mulf %68, %69 : vector<8x8xf32>
    %cst_35 = arith.constant dense<0xFF800000> : vector<8xf32>
    %71 = vector.multi_reduction <maximumf>, %70, %cst_35 [1] : vector<8x8xf32> to vector<8xf32>
    %72 = vector.shape_cast %71 : vector<8xf32> to vector<8x1xf32>
    %73 = vector.broadcast %72 : vector<8x1xf32> to vector<8x8xf32>
    %74 = arith.subf %70, %73 : vector<8x8xf32>
    %75 = math.exp %74 : vector<8x8xf32>
    %76 = vector.broadcast %1 : vector<1x8xf32> to vector<8x8xf32>
    %77 = arith.mulf %75, %76 : vector<8x8xf32>
    %cst_36 = arith.constant dense<0.000000e+00> : vector<8xf32>
    %78 = vector.multi_reduction <add>, %77, %cst_36 [1] : vector<8x8xf32> to vector<8xf32>
    %79 = vector.shape_cast %78 : vector<8xf32> to vector<8x1xf32>
    %cst_37 = arith.constant 0.000000e+00 : f32
    %80 = vector.broadcast %cst_37 : f32 to vector<8x1xf32>
    %81 = arith.cmpf oeq, %79, %80 : vector<8x1xf32>
    %82 = arith.extui %81 : vector<8x1xi1> to vector<8x1xi32>
    %83 = arith.sitofp %82 : vector<8x1xi32> to vector<8x1xf32>
    %84 = arith.addf %79, %83 : vector<8x1xf32>
    %85 = vector.broadcast %84 : vector<8x1xf32> to vector<8x8xf32>
    %86 = arith.divf %77, %85 : vector<8x8xf32>
    %cst_38 = arith.constant dense<0.000000e+00> : vector<8x64xf32>
    %87 = tpu.matmul %86, %67, %cst_38 {dimension_numbers = #tpu.dot_dimension_numbers<[1], [0], [0], [1], [0, 0, 1, 1], [], []>} : vector<8x8xf32>, vector<8x64xf32>, vector<8x64xf32> -> vector<8x64xf32>
    %c128_39 = arith.constant 128 : index
    %c0_40 = arith.constant 0 : index
    %88 = vector.load %arg8[%c128_39, %c0_40] : memref<768x32xf32, #tpu.memory_space<vmem>>, vector<64x32xf32>
    %cst_41 = arith.constant dense<0.000000e+00> : vector<8x32xf32>
    %89 = tpu.matmul %87, %88, %cst_41 {dimension_numbers = #tpu.dot_dimension_numbers<[1], [0], [0], [1], [0, 0, 1, 1], [], []>} : vector<8x64xf32>, vector<64x32xf32>, vector<8x32xf32> -> vector<8x32xf32>
    %90 = arith.addf %64, %89 : vector<8x32xf32>
    %91 = vector.extract_strided_slice %11 {offsets = [0, 192], sizes = [8, 64], strides = [1, 1]} : vector<8x768xf32> to vector<8x64xf32>
    %c0_42 = arith.constant 0 : index
    %c192 = arith.constant 192 : index
    %92 = vector.load %arg13[%c0_42, %c192] : memref<8x1536xf32, #tpu.memory_space<vmem>>, vector<8x64xf32>
    %c0_43 = arith.constant 0 : index
    %c960 = arith.constant 960 : index
    %93 = vector.load %arg13[%c0_43, %c960] : memref<8x1536xf32, #tpu.memory_space<vmem>>, vector<8x64xf32>
    %cst_44 = arith.constant dense<0.000000e+00> : vector<8x8xf32>
    %94 = tpu.matmul %91, %92, %cst_44 {dimension_numbers = #tpu.dot_dimension_numbers<[1], [1], [0], [0], [0, 0, 1, 0], [], []>} : vector<8x64xf32>, vector<8x64xf32>, vector<8x8xf32> -> vector<8x8xf32>
    %95 = vector.broadcast %1 : vector<1x8xf32> to vector<8x8xf32>
    %96 = arith.mulf %94, %95 : vector<8x8xf32>
    %cst_45 = arith.constant dense<0xFF800000> : vector<8xf32>
    %97 = vector.multi_reduction <maximumf>, %96, %cst_45 [1] : vector<8x8xf32> to vector<8xf32>
    %98 = vector.shape_cast %97 : vector<8xf32> to vector<8x1xf32>
    %99 = vector.broadcast %98 : vector<8x1xf32> to vector<8x8xf32>
    %100 = arith.subf %96, %99 : vector<8x8xf32>
    %101 = math.exp %100 : vector<8x8xf32>
    %102 = vector.broadcast %1 : vector<1x8xf32> to vector<8x8xf32>
    %103 = arith.mulf %101, %102 : vector<8x8xf32>
    %cst_46 = arith.constant dense<0.000000e+00> : vector<8xf32>
    %104 = vector.multi_reduction <add>, %103, %cst_46 [1] : vector<8x8xf32> to vector<8xf32>
    %105 = vector.shape_cast %104 : vector<8xf32> to vector<8x1xf32>
    %cst_47 = arith.constant 0.000000e+00 : f32
    %106 = vector.broadcast %cst_47 : f32 to vector<8x1xf32>
    %107 = arith.cmpf oeq, %105, %106 : vector<8x1xf32>
    %108 = arith.extui %107 : vector<8x1xi1> to vector<8x1xi32>
    %109 = arith.sitofp %108 : vector<8x1xi32> to vector<8x1xf32>
    %110 = arith.addf %105, %109 : vector<8x1xf32>
    %111 = vector.broadcast %110 : vector<8x1xf32> to vector<8x8xf32>
    %112 = arith.divf %103, %111 : vector<8x8xf32>
    %cst_48 = arith.constant dense<0.000000e+00> : vector<8x64xf32>
    %113 = tpu.matmul %112, %93, %cst_48 {dimension_numbers = #tpu.dot_dimension_numbers<[1], [0], [0], [1], [0, 0, 1, 1], [], []>} : vector<8x8xf32>, vector<8x64xf32>, vector<8x64xf32> -> vector<8x64xf32>
    %c192_49 = arith.constant 192 : index
    %c0_50 = arith.constant 0 : index
    %114 = vector.load %arg8[%c192_49, %c0_50] : memref<768x32xf32, #tpu.memory_space<vmem>>, vector<64x32xf32>
    %cst_51 = arith.constant dense<0.000000e+00> : vector<8x32xf32>
    %115 = tpu.matmul %113, %114, %cst_51 {dimension_numbers = #tpu.dot_dimension_numbers<[1], [0], [0], [1], [0, 0, 1, 1], [], []>} : vector<8x64xf32>, vector<64x32xf32>, vector<8x32xf32> -> vector<8x32xf32>
    %116 = arith.addf %90, %115 : vector<8x32xf32>
    %117 = vector.extract_strided_slice %11 {offsets = [0, 256], sizes = [8, 64], strides = [1, 1]} : vector<8x768xf32> to vector<8x64xf32>
    %c0_52 = arith.constant 0 : index
    %c256 = arith.constant 256 : index
    %118 = vector.load %arg13[%c0_52, %c256] : memref<8x1536xf32, #tpu.memory_space<vmem>>, vector<8x64xf32>
    %c0_53 = arith.constant 0 : index
    %c1024 = arith.constant 1024 : index
    %119 = vector.load %arg13[%c0_53, %c1024] : memref<8x1536xf32, #tpu.memory_space<vmem>>, vector<8x64xf32>
    %cst_54 = arith.constant dense<0.000000e+00> : vector<8x8xf32>
    %120 = tpu.matmul %117, %118, %cst_54 {dimension_numbers = #tpu.dot_dimension_numbers<[1], [1], [0], [0], [0, 0, 1, 0], [], []>} : vector<8x64xf32>, vector<8x64xf32>, vector<8x8xf32> -> vector<8x8xf32>
    %121 = vector.broadcast %1 : vector<1x8xf32> to vector<8x8xf32>
    %122 = arith.mulf %120, %121 : vector<8x8xf32>
    %cst_55 = arith.constant dense<0xFF800000> : vector<8xf32>
    %123 = vector.multi_reduction <maximumf>, %122, %cst_55 [1] : vector<8x8xf32> to vector<8xf32>
    %124 = vector.shape_cast %123 : vector<8xf32> to vector<8x1xf32>
    %125 = vector.broadcast %124 : vector<8x1xf32> to vector<8x8xf32>
    %126 = arith.subf %122, %125 : vector<8x8xf32>
    %127 = math.exp %126 : vector<8x8xf32>
    %128 = vector.broadcast %1 : vector<1x8xf32> to vector<8x8xf32>
    %129 = arith.mulf %127, %128 : vector<8x8xf32>
    %cst_56 = arith.constant dense<0.000000e+00> : vector<8xf32>
    %130 = vector.multi_reduction <add>, %129, %cst_56 [1] : vector<8x8xf32> to vector<8xf32>
    %131 = vector.shape_cast %130 : vector<8xf32> to vector<8x1xf32>
    %cst_57 = arith.constant 0.000000e+00 : f32
    %132 = vector.broadcast %cst_57 : f32 to vector<8x1xf32>
    %133 = arith.cmpf oeq, %131, %132 : vector<8x1xf32>
    %134 = arith.extui %133 : vector<8x1xi1> to vector<8x1xi32>
    %135 = arith.sitofp %134 : vector<8x1xi32> to vector<8x1xf32>
    %136 = arith.addf %131, %135 : vector<8x1xf32>
    %137 = vector.broadcast %136 : vector<8x1xf32> to vector<8x8xf32>
    %138 = arith.divf %129, %137 : vector<8x8xf32>
    %cst_58 = arith.constant dense<0.000000e+00> : vector<8x64xf32>
    %139 = tpu.matmul %138, %119, %cst_58 {dimension_numbers = #tpu.dot_dimension_numbers<[1], [0], [0], [1], [0, 0, 1, 1], [], []>} : vector<8x8xf32>, vector<8x64xf32>, vector<8x64xf32> -> vector<8x64xf32>
    %c256_59 = arith.constant 256 : index
    %c0_60 = arith.constant 0 : index
    %140 = vector.load %arg8[%c256_59, %c0_60] : memref<768x32xf32, #tpu.memory_space<vmem>>, vector<64x32xf32>
    %cst_61 = arith.constant dense<0.000000e+00> : vector<8x32xf32>
    %141 = tpu.matmul %139, %140, %cst_61 {dimension_numbers = #tpu.dot_dimension_numbers<[1], [0], [0], [1], [0, 0, 1, 1], [], []>} : vector<8x64xf32>, vector<64x32xf32>, vector<8x32xf32> -> vector<8x32xf32>
    %142 = arith.addf %116, %141 : vector<8x32xf32>
    %143 = vector.extract_strided_slice %11 {offsets = [0, 320], sizes = [8, 64], strides = [1, 1]} : vector<8x768xf32> to vector<8x64xf32>
    %c0_62 = arith.constant 0 : index
    %c320 = arith.constant 320 : index
    %144 = vector.load %arg13[%c0_62, %c320] : memref<8x1536xf32, #tpu.memory_space<vmem>>, vector<8x64xf32>
    %c0_63 = arith.constant 0 : index
    %c1088 = arith.constant 1088 : index
    %145 = vector.load %arg13[%c0_63, %c1088] : memref<8x1536xf32, #tpu.memory_space<vmem>>, vector<8x64xf32>
    %cst_64 = arith.constant dense<0.000000e+00> : vector<8x8xf32>
    %146 = tpu.matmul %143, %144, %cst_64 {dimension_numbers = #tpu.dot_dimension_numbers<[1], [1], [0], [0], [0, 0, 1, 0], [], []>} : vector<8x64xf32>, vector<8x64xf32>, vector<8x8xf32> -> vector<8x8xf32>
    %147 = vector.broadcast %1 : vector<1x8xf32> to vector<8x8xf32>
    %148 = arith.mulf %146, %147 : vector<8x8xf32>
    %cst_65 = arith.constant dense<0xFF800000> : vector<8xf32>
    %149 = vector.multi_reduction <maximumf>, %148, %cst_65 [1] : vector<8x8xf32> to vector<8xf32>
    %150 = vector.shape_cast %149 : vector<8xf32> to vector<8x1xf32>
    %151 = vector.broadcast %150 : vector<8x1xf32> to vector<8x8xf32>
    %152 = arith.subf %148, %151 : vector<8x8xf32>
    %153 = math.exp %152 : vector<8x8xf32>
    %154 = vector.broadcast %1 : vector<1x8xf32> to vector<8x8xf32>
    %155 = arith.mulf %153, %154 : vector<8x8xf32>
    %cst_66 = arith.constant dense<0.000000e+00> : vector<8xf32>
    %156 = vector.multi_reduction <add>, %155, %cst_66 [1] : vector<8x8xf32> to vector<8xf32>
    %157 = vector.shape_cast %156 : vector<8xf32> to vector<8x1xf32>
    %cst_67 = arith.constant 0.000000e+00 : f32
    %158 = vector.broadcast %cst_67 : f32 to vector<8x1xf32>
    %159 = arith.cmpf oeq, %157, %158 : vector<8x1xf32>
    %160 = arith.extui %159 : vector<8x1xi1> to vector<8x1xi32>
    %161 = arith.sitofp %160 : vector<8x1xi32> to vector<8x1xf32>
    %162 = arith.addf %157, %161 : vector<8x1xf32>
    %163 = vector.broadcast %162 : vector<8x1xf32> to vector<8x8xf32>
    %164 = arith.divf %155, %163 : vector<8x8xf32>
    %cst_68 = arith.constant dense<0.000000e+00> : vector<8x64xf32>
    %165 = tpu.matmul %164, %145, %cst_68 {dimension_numbers = #tpu.dot_dimension_numbers<[1], [0], [0], [1], [0, 0, 1, 1], [], []>} : vector<8x8xf32>, vector<8x64xf32>, vector<8x64xf32> -> vector<8x64xf32>
    %c320_69 = arith.constant 320 : index
    %c0_70 = arith.constant 0 : index
    %166 = vector.load %arg8[%c320_69, %c0_70] : memref<768x32xf32, #tpu.memory_space<vmem>>, vector<64x32xf32>
    %cst_71 = arith.constant dense<0.000000e+00> : vector<8x32xf32>
    %167 = tpu.matmul %165, %166, %cst_71 {dimension_numbers = #tpu.dot_dimension_numbers<[1], [0], [0], [1], [0, 0, 1, 1], [], []>} : vector<8x64xf32>, vector<64x32xf32>, vector<8x32xf32> -> vector<8x32xf32>
    %168 = arith.addf %142, %167 : vector<8x32xf32>
    %169 = vector.extract_strided_slice %11 {offsets = [0, 384], sizes = [8, 64], strides = [1, 1]} : vector<8x768xf32> to vector<8x64xf32>
    %c0_72 = arith.constant 0 : index
    %c384 = arith.constant 384 : index
    %170 = vector.load %arg13[%c0_72, %c384] : memref<8x1536xf32, #tpu.memory_space<vmem>>, vector<8x64xf32>
    %c0_73 = arith.constant 0 : index
    %c1152 = arith.constant 1152 : index
    %171 = vector.load %arg13[%c0_73, %c1152] : memref<8x1536xf32, #tpu.memory_space<vmem>>, vector<8x64xf32>
    %cst_74 = arith.constant dense<0.000000e+00> : vector<8x8xf32>
    %172 = tpu.matmul %169, %170, %cst_74 {dimension_numbers = #tpu.dot_dimension_numbers<[1], [1], [0], [0], [0, 0, 1, 0], [], []>} : vector<8x64xf32>, vector<8x64xf32>, vector<8x8xf32> -> vector<8x8xf32>
    %173 = vector.broadcast %1 : vector<1x8xf32> to vector<8x8xf32>
    %174 = arith.mulf %172, %173 : vector<8x8xf32>
    %cst_75 = arith.constant dense<0xFF800000> : vector<8xf32>
    %175 = vector.multi_reduction <maximumf>, %174, %cst_75 [1] : vector<8x8xf32> to vector<8xf32>
    %176 = vector.shape_cast %175 : vector<8xf32> to vector<8x1xf32>
    %177 = vector.broadcast %176 : vector<8x1xf32> to vector<8x8xf32>
    %178 = arith.subf %174, %177 : vector<8x8xf32>
    %179 = math.exp %178 : vector<8x8xf32>
    %180 = vector.broadcast %1 : vector<1x8xf32> to vector<8x8xf32>
    %181 = arith.mulf %179, %180 : vector<8x8xf32>
    %cst_76 = arith.constant dense<0.000000e+00> : vector<8xf32>
    %182 = vector.multi_reduction <add>, %181, %cst_76 [1] : vector<8x8xf32> to vector<8xf32>
    %183 = vector.shape_cast %182 : vector<8xf32> to vector<8x1xf32>
    %cst_77 = arith.constant 0.000000e+00 : f32
    %184 = vector.broadcast %cst_77 : f32 to vector<8x1xf32>
    %185 = arith.cmpf oeq, %183, %184 : vector<8x1xf32>
    %186 = arith.extui %185 : vector<8x1xi1> to vector<8x1xi32>
    %187 = arith.sitofp %186 : vector<8x1xi32> to vector<8x1xf32>
    %188 = arith.addf %183, %187 : vector<8x1xf32>
    %189 = vector.broadcast %188 : vector<8x1xf32> to vector<8x8xf32>
    %190 = arith.divf %181, %189 : vector<8x8xf32>
    %cst_78 = arith.constant dense<0.000000e+00> : vector<8x64xf32>
    %191 = tpu.matmul %190, %171, %cst_78 {dimension_numbers = #tpu.dot_dimension_numbers<[1], [0], [0], [1], [0, 0, 1, 1], [], []>} : vector<8x8xf32>, vector<8x64xf32>, vector<8x64xf32> -> vector<8x64xf32>
    %c384_79 = arith.constant 384 : index
    %c0_80 = arith.constant 0 : index
    %192 = vector.load %arg8[%c384_79, %c0_80] : memref<768x32xf32, #tpu.memory_space<vmem>>, vector<64x32xf32>
    %cst_81 = arith.constant dense<0.000000e+00> : vector<8x32xf32>
    %193 = tpu.matmul %191, %192, %cst_81 {dimension_numbers = #tpu.dot_dimension_numbers<[1], [0], [0], [1], [0, 0, 1, 1], [], []>} : vector<8x64xf32>, vector<64x32xf32>, vector<8x32xf32> -> vector<8x32xf32>
    %194 = arith.addf %168, %193 : vector<8x32xf32>
    %195 = vector.extract_strided_slice %11 {offsets = [0, 448], sizes = [8, 64], strides = [1, 1]} : vector<8x768xf32> to vector<8x64xf32>
    %c0_82 = arith.constant 0 : index
    %c448 = arith.constant 448 : index
    %196 = vector.load %arg13[%c0_82, %c448] : memref<8x1536xf32, #tpu.memory_space<vmem>>, vector<8x64xf32>
    %c0_83 = arith.constant 0 : index
    %c1216 = arith.constant 1216 : index
    %197 = vector.load %arg13[%c0_83, %c1216] : memref<8x1536xf32, #tpu.memory_space<vmem>>, vector<8x64xf32>
    %cst_84 = arith.constant dense<0.000000e+00> : vector<8x8xf32>
    %198 = tpu.matmul %195, %196, %cst_84 {dimension_numbers = #tpu.dot_dimension_numbers<[1], [1], [0], [0], [0, 0, 1, 0], [], []>} : vector<8x64xf32>, vector<8x64xf32>, vector<8x8xf32> -> vector<8x8xf32>
    %199 = vector.broadcast %1 : vector<1x8xf32> to vector<8x8xf32>
    %200 = arith.mulf %198, %199 : vector<8x8xf32>
    %cst_85 = arith.constant dense<0xFF800000> : vector<8xf32>
    %201 = vector.multi_reduction <maximumf>, %200, %cst_85 [1] : vector<8x8xf32> to vector<8xf32>
    %202 = vector.shape_cast %201 : vector<8xf32> to vector<8x1xf32>
    %203 = vector.broadcast %202 : vector<8x1xf32> to vector<8x8xf32>
    %204 = arith.subf %200, %203 : vector<8x8xf32>
    %205 = math.exp %204 : vector<8x8xf32>
    %206 = vector.broadcast %1 : vector<1x8xf32> to vector<8x8xf32>
    %207 = arith.mulf %205, %206 : vector<8x8xf32>
    %cst_86 = arith.constant dense<0.000000e+00> : vector<8xf32>
    %208 = vector.multi_reduction <add>, %207, %cst_86 [1] : vector<8x8xf32> to vector<8xf32>
    %209 = vector.shape_cast %208 : vector<8xf32> to vector<8x1xf32>
    %cst_87 = arith.constant 0.000000e+00 : f32
    %210 = vector.broadcast %cst_87 : f32 to vector<8x1xf32>
    %211 = arith.cmpf oeq, %209, %210 : vector<8x1xf32>
    %212 = arith.extui %211 : vector<8x1xi1> to vector<8x1xi32>
    %213 = arith.sitofp %212 : vector<8x1xi32> to vector<8x1xf32>
    %214 = arith.addf %209, %213 : vector<8x1xf32>
    %215 = vector.broadcast %214 : vector<8x1xf32> to vector<8x8xf32>
    %216 = arith.divf %207, %215 : vector<8x8xf32>
    %cst_88 = arith.constant dense<0.000000e+00> : vector<8x64xf32>
    %217 = tpu.matmul %216, %197, %cst_88 {dimension_numbers = #tpu.dot_dimension_numbers<[1], [0], [0], [1], [0, 0, 1, 1], [], []>} : vector<8x8xf32>, vector<8x64xf32>, vector<8x64xf32> -> vector<8x64xf32>
    %c448_89 = arith.constant 448 : index
    %c0_90 = arith.constant 0 : index
    %218 = vector.load %arg8[%c448_89, %c0_90] : memref<768x32xf32, #tpu.memory_space<vmem>>, vector<64x32xf32>
    %cst_91 = arith.constant dense<0.000000e+00> : vector<8x32xf32>
    %219 = tpu.matmul %217, %218, %cst_91 {dimension_numbers = #tpu.dot_dimension_numbers<[1], [0], [0], [1], [0, 0, 1, 1], [], []>} : vector<8x64xf32>, vector<64x32xf32>, vector<8x32xf32> -> vector<8x32xf32>
    %220 = arith.addf %194, %219 : vector<8x32xf32>
    %221 = vector.extract_strided_slice %11 {offsets = [0, 512], sizes = [8, 64], strides = [1, 1]} : vector<8x768xf32> to vector<8x64xf32>
    %c0_92 = arith.constant 0 : index
    %c512 = arith.constant 512 : index
    %222 = vector.load %arg13[%c0_92, %c512] : memref<8x1536xf32, #tpu.memory_space<vmem>>, vector<8x64xf32>
    %c0_93 = arith.constant 0 : index
    %c1280 = arith.constant 1280 : index
    %223 = vector.load %arg13[%c0_93, %c1280] : memref<8x1536xf32, #tpu.memory_space<vmem>>, vector<8x64xf32>
    %cst_94 = arith.constant dense<0.000000e+00> : vector<8x8xf32>
    %224 = tpu.matmul %221, %222, %cst_94 {dimension_numbers = #tpu.dot_dimension_numbers<[1], [1], [0], [0], [0, 0, 1, 0], [], []>} : vector<8x64xf32>, vector<8x64xf32>, vector<8x8xf32> -> vector<8x8xf32>
    %225 = vector.broadcast %1 : vector<1x8xf32> to vector<8x8xf32>
    %226 = arith.mulf %224, %225 : vector<8x8xf32>
    %cst_95 = arith.constant dense<0xFF800000> : vector<8xf32>
    %227 = vector.multi_reduction <maximumf>, %226, %cst_95 [1] : vector<8x8xf32> to vector<8xf32>
    %228 = vector.shape_cast %227 : vector<8xf32> to vector<8x1xf32>
    %229 = vector.broadcast %228 : vector<8x1xf32> to vector<8x8xf32>
    %230 = arith.subf %226, %229 : vector<8x8xf32>
    %231 = math.exp %230 : vector<8x8xf32>
    %232 = vector.broadcast %1 : vector<1x8xf32> to vector<8x8xf32>
    %233 = arith.mulf %231, %232 : vector<8x8xf32>
    %cst_96 = arith.constant dense<0.000000e+00> : vector<8xf32>
    %234 = vector.multi_reduction <add>, %233, %cst_96 [1] : vector<8x8xf32> to vector<8xf32>
    %235 = vector.shape_cast %234 : vector<8xf32> to vector<8x1xf32>
    %cst_97 = arith.constant 0.000000e+00 : f32
    %236 = vector.broadcast %cst_97 : f32 to vector<8x1xf32>
    %237 = arith.cmpf oeq, %235, %236 : vector<8x1xf32>
    %238 = arith.extui %237 : vector<8x1xi1> to vector<8x1xi32>
    %239 = arith.sitofp %238 : vector<8x1xi32> to vector<8x1xf32>
    %240 = arith.addf %235, %239 : vector<8x1xf32>
    %241 = vector.broadcast %240 : vector<8x1xf32> to vector<8x8xf32>
    %242 = arith.divf %233, %241 : vector<8x8xf32>
    %cst_98 = arith.constant dense<0.000000e+00> : vector<8x64xf32>
    %243 = tpu.matmul %242, %223, %cst_98 {dimension_numbers = #tpu.dot_dimension_numbers<[1], [0], [0], [1], [0, 0, 1, 1], [], []>} : vector<8x8xf32>, vector<8x64xf32>, vector<8x64xf32> -> vector<8x64xf32>
    %c512_99 = arith.constant 512 : index
    %c0_100 = arith.constant 0 : index
    %244 = vector.load %arg8[%c512_99, %c0_100] : memref<768x32xf32, #tpu.memory_space<vmem>>, vector<64x32xf32>
    %cst_101 = arith.constant dense<0.000000e+00> : vector<8x32xf32>
    %245 = tpu.matmul %243, %244, %cst_101 {dimension_numbers = #tpu.dot_dimension_numbers<[1], [0], [0], [1], [0, 0, 1, 1], [], []>} : vector<8x64xf32>, vector<64x32xf32>, vector<8x32xf32> -> vector<8x32xf32>
    %246 = arith.addf %220, %245 : vector<8x32xf32>
    %247 = vector.extract_strided_slice %11 {offsets = [0, 576], sizes = [8, 64], strides = [1, 1]} : vector<8x768xf32> to vector<8x64xf32>
    %c0_102 = arith.constant 0 : index
    %c576 = arith.constant 576 : index
    %248 = vector.load %arg13[%c0_102, %c576] : memref<8x1536xf32, #tpu.memory_space<vmem>>, vector<8x64xf32>
    %c0_103 = arith.constant 0 : index
    %c1344 = arith.constant 1344 : index
    %249 = vector.load %arg13[%c0_103, %c1344] : memref<8x1536xf32, #tpu.memory_space<vmem>>, vector<8x64xf32>
    %cst_104 = arith.constant dense<0.000000e+00> : vector<8x8xf32>
    %250 = tpu.matmul %247, %248, %cst_104 {dimension_numbers = #tpu.dot_dimension_numbers<[1], [1], [0], [0], [0, 0, 1, 0], [], []>} : vector<8x64xf32>, vector<8x64xf32>, vector<8x8xf32> -> vector<8x8xf32>
    %251 = vector.broadcast %1 : vector<1x8xf32> to vector<8x8xf32>
    %252 = arith.mulf %250, %251 : vector<8x8xf32>
    %cst_105 = arith.constant dense<0xFF800000> : vector<8xf32>
    %253 = vector.multi_reduction <maximumf>, %252, %cst_105 [1] : vector<8x8xf32> to vector<8xf32>
    %254 = vector.shape_cast %253 : vector<8xf32> to vector<8x1xf32>
    %255 = vector.broadcast %254 : vector<8x1xf32> to vector<8x8xf32>
    %256 = arith.subf %252, %255 : vector<8x8xf32>
    %257 = math.exp %256 : vector<8x8xf32>
    %258 = vector.broadcast %1 : vector<1x8xf32> to vector<8x8xf32>
    %259 = arith.mulf %257, %258 : vector<8x8xf32>
    %cst_106 = arith.constant dense<0.000000e+00> : vector<8xf32>
    %260 = vector.multi_reduction <add>, %259, %cst_106 [1] : vector<8x8xf32> to vector<8xf32>
    %261 = vector.shape_cast %260 : vector<8xf32> to vector<8x1xf32>
    %cst_107 = arith.constant 0.000000e+00 : f32
    %262 = vector.broadcast %cst_107 : f32 to vector<8x1xf32>
    %263 = arith.cmpf oeq, %261, %262 : vector<8x1xf32>
    %264 = arith.extui %263 : vector<8x1xi1> to vector<8x1xi32>
    %265 = arith.sitofp %264 : vector<8x1xi32> to vector<8x1xf32>
    %266 = arith.addf %261, %265 : vector<8x1xf32>
    %267 = vector.broadcast %266 : vector<8x1xf32> to vector<8x8xf32>
    %268 = arith.divf %259, %267 : vector<8x8xf32>
    %cst_108 = arith.constant dense<0.000000e+00> : vector<8x64xf32>
    %269 = tpu.matmul %268, %249, %cst_108 {dimension_numbers = #tpu.dot_dimension_numbers<[1], [0], [0], [1], [0, 0, 1, 1], [], []>} : vector<8x8xf32>, vector<8x64xf32>, vector<8x64xf32> -> vector<8x64xf32>
    %c576_109 = arith.constant 576 : index
    %c0_110 = arith.constant 0 : index
    %270 = vector.load %arg8[%c576_109, %c0_110] : memref<768x32xf32, #tpu.memory_space<vmem>>, vector<64x32xf32>
    %cst_111 = arith.constant dense<0.000000e+00> : vector<8x32xf32>
    %271 = tpu.matmul %269, %270, %cst_111 {dimension_numbers = #tpu.dot_dimension_numbers<[1], [0], [0], [1], [0, 0, 1, 1], [], []>} : vector<8x64xf32>, vector<64x32xf32>, vector<8x32xf32> -> vector<8x32xf32>
    %272 = arith.addf %246, %271 : vector<8x32xf32>
    %273 = vector.extract_strided_slice %11 {offsets = [0, 640], sizes = [8, 64], strides = [1, 1]} : vector<8x768xf32> to vector<8x64xf32>
    %c0_112 = arith.constant 0 : index
    %c640 = arith.constant 640 : index
    %274 = vector.load %arg13[%c0_112, %c640] : memref<8x1536xf32, #tpu.memory_space<vmem>>, vector<8x64xf32>
    %c0_113 = arith.constant 0 : index
    %c1408 = arith.constant 1408 : index
    %275 = vector.load %arg13[%c0_113, %c1408] : memref<8x1536xf32, #tpu.memory_space<vmem>>, vector<8x64xf32>
    %cst_114 = arith.constant dense<0.000000e+00> : vector<8x8xf32>
    %276 = tpu.matmul %273, %274, %cst_114 {dimension_numbers = #tpu.dot_dimension_numbers<[1], [1], [0], [0], [0, 0, 1, 0], [], []>} : vector<8x64xf32>, vector<8x64xf32>, vector<8x8xf32> -> vector<8x8xf32>
    %277 = vector.broadcast %1 : vector<1x8xf32> to vector<8x8xf32>
    %278 = arith.mulf %276, %277 : vector<8x8xf32>
    %cst_115 = arith.constant dense<0xFF800000> : vector<8xf32>
    %279 = vector.multi_reduction <maximumf>, %278, %cst_115 [1] : vector<8x8xf32> to vector<8xf32>
    %280 = vector.shape_cast %279 : vector<8xf32> to vector<8x1xf32>
    %281 = vector.broadcast %280 : vector<8x1xf32> to vector<8x8xf32>
    %282 = arith.subf %278, %281 : vector<8x8xf32>
    %283 = math.exp %282 : vector<8x8xf32>
    %284 = vector.broadcast %1 : vector<1x8xf32> to vector<8x8xf32>
    %285 = arith.mulf %283, %284 : vector<8x8xf32>
    %cst_116 = arith.constant dense<0.000000e+00> : vector<8xf32>
    %286 = vector.multi_reduction <add>, %285, %cst_116 [1] : vector<8x8xf32> to vector<8xf32>
    %287 = vector.shape_cast %286 : vector<8xf32> to vector<8x1xf32>
    %cst_117 = arith.constant 0.000000e+00 : f32
    %288 = vector.broadcast %cst_117 : f32 to vector<8x1xf32>
    %289 = arith.cmpf oeq, %287, %288 : vector<8x1xf32>
    %290 = arith.extui %289 : vector<8x1xi1> to vector<8x1xi32>
    %291 = arith.sitofp %290 : vector<8x1xi32> to vector<8x1xf32>
    %292 = arith.addf %287, %291 : vector<8x1xf32>
    %293 = vector.broadcast %292 : vector<8x1xf32> to vector<8x8xf32>
    %294 = arith.divf %285, %293 : vector<8x8xf32>
    %cst_118 = arith.constant dense<0.000000e+00> : vector<8x64xf32>
    %295 = tpu.matmul %294, %275, %cst_118 {dimension_numbers = #tpu.dot_dimension_numbers<[1], [0], [0], [1], [0, 0, 1, 1], [], []>} : vector<8x8xf32>, vector<8x64xf32>, vector<8x64xf32> -> vector<8x64xf32>
    %c640_119 = arith.constant 640 : index
    %c0_120 = arith.constant 0 : index
    %296 = vector.load %arg8[%c640_119, %c0_120] : memref<768x32xf32, #tpu.memory_space<vmem>>, vector<64x32xf32>
    %cst_121 = arith.constant dense<0.000000e+00> : vector<8x32xf32>
    %297 = tpu.matmul %295, %296, %cst_121 {dimension_numbers = #tpu.dot_dimension_numbers<[1], [0], [0], [1], [0, 0, 1, 1], [], []>} : vector<8x64xf32>, vector<64x32xf32>, vector<8x32xf32> -> vector<8x32xf32>
    %298 = arith.addf %272, %297 : vector<8x32xf32>
    %299 = vector.extract_strided_slice %11 {offsets = [0, 704], sizes = [8, 64], strides = [1, 1]} : vector<8x768xf32> to vector<8x64xf32>
    %c0_122 = arith.constant 0 : index
    %c704 = arith.constant 704 : index
    %300 = vector.load %arg13[%c0_122, %c704] : memref<8x1536xf32, #tpu.memory_space<vmem>>, vector<8x64xf32>
    %c0_123 = arith.constant 0 : index
    %c1472 = arith.constant 1472 : index
    %301 = vector.load %arg13[%c0_123, %c1472] : memref<8x1536xf32, #tpu.memory_space<vmem>>, vector<8x64xf32>
    %cst_124 = arith.constant dense<0.000000e+00> : vector<8x8xf32>
    %302 = tpu.matmul %299, %300, %cst_124 {dimension_numbers = #tpu.dot_dimension_numbers<[1], [1], [0], [0], [0, 0, 1, 0], [], []>} : vector<8x64xf32>, vector<8x64xf32>, vector<8x8xf32> -> vector<8x8xf32>
    %303 = vector.broadcast %1 : vector<1x8xf32> to vector<8x8xf32>
    %304 = arith.mulf %302, %303 : vector<8x8xf32>
    %cst_125 = arith.constant dense<0xFF800000> : vector<8xf32>
    %305 = vector.multi_reduction <maximumf>, %304, %cst_125 [1] : vector<8x8xf32> to vector<8xf32>
    %306 = vector.shape_cast %305 : vector<8xf32> to vector<8x1xf32>
    %307 = vector.broadcast %306 : vector<8x1xf32> to vector<8x8xf32>
    %308 = arith.subf %304, %307 : vector<8x8xf32>
    %309 = math.exp %308 : vector<8x8xf32>
    %310 = vector.broadcast %1 : vector<1x8xf32> to vector<8x8xf32>
    %311 = arith.mulf %309, %310 : vector<8x8xf32>
    %cst_126 = arith.constant dense<0.000000e+00> : vector<8xf32>
    %312 = vector.multi_reduction <add>, %311, %cst_126 [1] : vector<8x8xf32> to vector<8xf32>
    %313 = vector.shape_cast %312 : vector<8xf32> to vector<8x1xf32>
    %cst_127 = arith.constant 0.000000e+00 : f32
    %314 = vector.broadcast %cst_127 : f32 to vector<8x1xf32>
    %315 = arith.cmpf oeq, %313, %314 : vector<8x1xf32>
    %316 = arith.extui %315 : vector<8x1xi1> to vector<8x1xi32>
    %317 = arith.sitofp %316 : vector<8x1xi32> to vector<8x1xf32>
    %318 = arith.addf %313, %317 : vector<8x1xf32>
    %319 = vector.broadcast %318 : vector<8x1xf32> to vector<8x8xf32>
    %320 = arith.divf %311, %319 : vector<8x8xf32>
    %cst_128 = arith.constant dense<0.000000e+00> : vector<8x64xf32>
    %321 = tpu.matmul %320, %301, %cst_128 {dimension_numbers = #tpu.dot_dimension_numbers<[1], [0], [0], [1], [0, 0, 1, 1], [], []>} : vector<8x8xf32>, vector<8x64xf32>, vector<8x64xf32> -> vector<8x64xf32>
    %c704_129 = arith.constant 704 : index
    %c0_130 = arith.constant 0 : index
    %322 = vector.load %arg8[%c704_129, %c0_130] : memref<768x32xf32, #tpu.memory_space<vmem>>, vector<64x32xf32>
    %cst_131 = arith.constant dense<0.000000e+00> : vector<8x32xf32>
    %323 = tpu.matmul %321, %322, %cst_131 {dimension_numbers = #tpu.dot_dimension_numbers<[1], [0], [0], [1], [0, 0, 1, 1], [], []>} : vector<8x64xf32>, vector<64x32xf32>, vector<8x32xf32> -> vector<8x32xf32>
    %324 = arith.addf %298, %323 : vector<8x32xf32>
    %c0_132 = arith.constant 0 : index
    %c0_133 = arith.constant 0 : index
    %325 = vector.load %arg9[%c0_132, %c0_133] : memref<1x32xf32, #tpu.memory_space<vmem>>, vector<1x32xf32>
    %326 = vector.broadcast %325 : vector<1x32xf32> to vector<8x32xf32>
    %327 = arith.addf %324, %326 : vector<8x32xf32>
    %328 = arith.addf %327, %6 : vector<8x32xf32>
    %cst_134 = arith.constant dense<0.000000e+00> : vector<8xf32>
    %329 = vector.multi_reduction <add>, %328, %cst_134 [1] : vector<8x32xf32> to vector<8xf32>
    %330 = vector.shape_cast %329 : vector<8xf32> to vector<8x1xf32>
    %cst_135 = arith.constant 3.200000e+01 : f32
    %331 = vector.broadcast %cst_135 : f32 to vector<8x1xf32>
    %332 = arith.divf %330, %331 : vector<8x1xf32>
    %333 = vector.broadcast %332 : vector<8x1xf32> to vector<8x32xf32>
    %334 = arith.subf %328, %333 : vector<8x32xf32>
    %335 = arith.mulf %334, %334 : vector<8x32xf32>
    %cst_136 = arith.constant dense<0.000000e+00> : vector<8xf32>
    %336 = vector.multi_reduction <add>, %335, %cst_136 [1] : vector<8x32xf32> to vector<8xf32>
    %337 = vector.shape_cast %336 : vector<8xf32> to vector<8x1xf32>
    %cst_137 = arith.constant 3.200000e+01 : f32
    %338 = vector.broadcast %cst_137 : f32 to vector<8x1xf32>
    %339 = arith.divf %337, %338 : vector<8x1xf32>
    %340 = vector.broadcast %332 : vector<8x1xf32> to vector<8x32xf32>
    %341 = arith.subf %328, %340 : vector<8x32xf32>
    %cst_138 = arith.constant 9.99999974E-6 : f32
    %342 = vector.broadcast %cst_138 : f32 to vector<8x1xf32>
    %343 = arith.addf %339, %342 : vector<8x1xf32>
    %344 = math.rsqrt %343 : vector<8x1xf32>
    %345 = vector.broadcast %344 : vector<8x1xf32> to vector<8x32xf32>
    %346 = arith.mulf %341, %345 : vector<8x32xf32>
    %c0_139 = arith.constant 0 : index
    %c0_140 = arith.constant 0 : index
    %347 = vector.load %arg10[%c0_139, %c0_140] : memref<1x32xf32, #tpu.memory_space<vmem>>, vector<1x32xf32>
    %348 = vector.broadcast %347 : vector<1x32xf32> to vector<8x32xf32>
    %349 = arith.mulf %346, %348 : vector<8x32xf32>
    %c0_141 = arith.constant 0 : index
    %c0_142 = arith.constant 0 : index
    %350 = vector.load %arg11[%c0_141, %c0_142] : memref<1x32xf32, #tpu.memory_space<vmem>>, vector<1x32xf32>
    %351 = vector.broadcast %350 : vector<1x32xf32> to vector<8x32xf32>
    %352 = arith.addf %349, %351 : vector<8x32xf32>
    %c0_143 = arith.constant 0 : index
    %c0_144 = arith.constant 0 : index
    %c0_145 = arith.constant 0 : index
    %353 = vector.load %arg12[%c0_143, %c0_144, %c0_145] : memref<1x8x32xf32, #tpu.memory_space<vmem>>, vector<1x8x32xf32>
    %354 = vector.shape_cast %353 : vector<1x8x32xf32> to vector<8x32xf32>
    %355 = vector.shape_cast %352 : vector<8x32xf32> to vector<1x8x32xf32>
    tpu.vector_store %arg12[%c0_143, %c0_144, %c0_145], %355 {strides = array<i32>} : memref<1x8x32xf32, #tpu.memory_space<vmem>>, vector<1x8x32xf32>,
    return
  }
  func.func @transform_0(%arg0: i32, %arg1: i32) -> (i32, i32, i32) {
    %c0_i32 = arith.constant 0 : i32
    %c0_i32_0 = arith.constant 0 : i32
    %c0_i32_1 = arith.constant 0 : i32
    return %arg0, %c0_i32, %c0_i32_0 : i32, i32, i32
  }
  func.func @transform_1(%arg0: i32, %arg1: i32) -> (i32, i32, i32) {
    %c0_i32 = arith.constant 0 : i32
    %c0_i32_0 = arith.constant 0 : i32
    %c0_i32_1 = arith.constant 0 : i32
    return %arg0, %c0_i32, %c0_i32_0 : i32, i32, i32
  }
  func.func @transform_2(%arg0: i32, %arg1: i32) -> (i32, i32) {
    %c0_i32 = arith.constant 0 : i32
    %c0_i32_0 = arith.constant 0 : i32
    %c0_i32_1 = arith.constant 0 : i32
    return %c0_i32, %c0_i32_0 : i32, i32
  }
  func.func @transform_3(%arg0: i32, %arg1: i32) -> (i32, i32) {
    %c0_i32 = arith.constant 0 : i32
    %c0_i32_0 = arith.constant 0 : i32
    %c0_i32_1 = arith.constant 0 : i32
    return %c0_i32, %c0_i32_0 : i32, i32
  }
  func.func @transform_4(%arg0: i32, %arg1: i32) -> (i32, i32) {
    %c0_i32 = arith.constant 0 : i32
    %c0_i32_0 = arith.constant 0 : i32
    %c0_i32_1 = arith.constant 0 : i32
    return %c0_i32, %c0_i32_0 : i32, i32
  }
  func.func @transform_5(%arg0: i32, %arg1: i32) -> (i32, i32) {
    %c0_i32 = arith.constant 0 : i32
    %c0_i32_0 = arith.constant 0 : i32
    %c0_i32_1 = arith.constant 0 : i32
    return %c0_i32, %c0_i32_0 : i32, i32
  }
  func.func @transform_6(%arg0: i32, %arg1: i32) -> (i32, i32) {
    %c0_i32 = arith.constant 0 : i32
    %c0_i32_0 = arith.constant 0 : i32
    %c0_i32_1 = arith.constant 0 : i32
    return %c0_i32, %c0_i32_0 : i32, i32
  }
  func.func @transform_7(%arg0: i32, %arg1: i32) -> (i32, i32) {
    %c0_i32 = arith.constant 0 : i32
    %c0_i32_0 = arith.constant 0 : i32
    %c0_i32_1 = arith.constant 0 : i32
    return %c0_i32, %c0_i32_0 : i32, i32
  }
  func.func @transform_8(%arg0: i32, %arg1: i32) -> (i32, i32) {
    %c0_i32 = arith.constant 0 : i32
    %c0_i32_0 = arith.constant 0 : i32
    %c0_i32_1 = arith.constant 0 : i32
    return %c0_i32, %c0_i32_0 : i32, i32
  }
  func.func @transform_9(%arg0: i32, %arg1: i32) -> (i32, i32) {
    %c0_i32 = arith.constant 0 : i32
    %c0_i32_0 = arith.constant 0 : i32
    %c0_i32_1 = arith.constant 0 : i32
    return %c0_i32, %c0_i32_0 : i32, i32
  }
  func.func @transform_10(%arg0: i32, %arg1: i32) -> (i32, i32, i32) {
    %c0_i32 = arith.constant 0 : i32
    %c0_i32_0 = arith.constant 0 : i32
    return %arg0, %arg1, %c0_i32 : i32, i32, i32
  }
}

</mosaic_0001>

<bundles_post_ra>
// kernel: tpu_custom_call.1
= control target key start
LH: loop header
LB: loop body
LE: loop exit
PB: predicated region body
PF: predicated region fallthrough
CT: control target
= control target key end

     0   :  { %s6369_s0 = inlined_call_operand.vmem [shape: f32[2,8,32], index: 0, kind: input, shape index: {}]   ;;  %s6370_s1 = inlined_call_operand.vmem [shape: f32[2,1,8], index: 1, kind: input, shape index: {}]   ;;  %s6371_s2 = inlined_call_operand.vmem [shape: f32[32,768], index: 2, kind: input, shape index: {}]   ;;  %s6372_s3 = inlined_call_operand.vmem [shape: f32[1,768], index: 3, kind: input, shape index: {}]   ;;  %s6373_s4 = inlined_call_operand.vmem [shape: f32[32,1536], index: 4, kind: input, shape index: {}]   ;;  %s6374_s5 = inlined_call_operand.vmem [shape: f32[1,1536], index: 5, kind: input, shape index: {}]   ;;  %s6375_s6 = inlined_call_operand.vmem [shape: f32[768,32], index: 6, kind: input, shape index: {}]   ;;  %s6376_s7 = inlined_call_operand.vmem [shape: f32[1,32], index: 7, kind: input, shape index: {}]   ;;  %s6377_s8 = inlined_call_operand.vmem [shape: f32[1,32], index: 8, kind: input, shape index: {}]   ;;  %s6378_s9 = inlined_call_operand.vmem [shape: f32[1,32], index: 9, kind: input, shape index: {}]   ;;  %s6379_s10 = inlined_call_operand.hbm [shape: f32[2,8,32], index: 10, kind: output, shape index: {}]  }
   0x1   :  { %6383 = sst [smem:[#allocation7_spill]] %s6369_s0 }
   0x2   :  { %6384 = sst [smem:[#allocation8_spill]] %s6370_s1 }
   0x3   :  { %15 = vsyncpa [#allocation4], 0 }
   0x4   :  { %17 = vsyncpa [#allocation4 + $0x1], 0  ;;  %s5217_s13 = smov 0   ;;  %s5219_s14 = smov 0  }
   0x5   :  { %s5221_s15 = smov 0   ;;  %s5223_s16 = smov 0  }
   0x6   :  { %s5225_s17 = smov 0   ;;  %s5227_s18 = smov 0  }
   0x7 LB: > { %s4379_s19 = sadd.s32 4294967295, %s5156_s18   ;;  %s4380_s20 = sadd.s32 4294967294, %s5156_s18   ;;  %s5156_s18 = sphi %s5227_s18, %s23_s18   ;;  %s5152_s17 = sphi %s5225_s17, %s6396_s17   ;;  %s5148_s16 = sphi %s5223_s16, %s6395_s16   ;;  %s5144_s15 = sphi %s5221_s15, %s6394_s15   ;;  %s5140_s14 = sphi %s5219_s14, %s6393_s14   ;;  %s5136_s13 = sphi %s5217_s13, %s6392_s13  }
   0x8   : > { %s35_s21 = sadd.s32 1, %s5152_s17  ;;  %s264_s22 = sadd.s32 1, %s5144_s15 }
   0x9   : > { %p37_p0 = scmp.ge.s32.totalorder %s35_s21, 2  ;;  %p274_p1 = scmp.ne.s32.totalorder %s5144_s15, %s5140_s14 }
   0xa   : > { %p275_p2 = scmp.eq.s32.totalorder %s4379_s19, 1  ;;  %p280_p3 = scmp.ne.s32.totalorder %s5140_s14, %s5136_s13 }
   0xb   : > { %s6398_s21 = smov (%p37_p0, %s35_s21), 0  ;;  %p281_p5 = scmp.eq.s32.totalorder %s4380_s20, 1 }
   0xc   : > { %6385 = sst [smem:[#allocation6_spill]] %s6398_s21  ;;  %p5257_p4 = por %p275_p2, %p274_p1 }
   0xd   : > { %s259_s24 = ssub.s32 %s5152_s17, %s6398_s21  ;;  %p4383_p6 = scmp.ge.s32.totalorder %s5156_s18, 1 }
   0xe   : > { %p262_p7 = scmp.eq.s32.totalorder %s259_s24, 0  ;;  %p5264_p8 = por %p281_p5, %p280_p3 }
   0xf   : > { %p336_p9 = scmp.lt.s32.totalorder %s5156_s18, 3 }
  0x10   : > { %s5270_s26 = scalar_select %p262_p7, %s5144_s15, %s264_s22  }
  0x11   : > { %p337_p10 = pnand %p4383_p6, %p336_p9 }
  0x12   : > { %p376_p11 = scmp.lt.s32.totalorder (!%p337_p10), %s5148_s16, 1  ;;  %s6388_s0 = sld [smem:[#allocation7_spill]] (!%p337_p10) }
  0x13   : > { %340 = sbr.rel (%p337_p10) target bundleno = 5660 (0x161c), region = 60  ;;  %s6389_s1 = sld [smem:[#allocation8_spill]] (!%p337_p10) }
  0x14   : > { %s6390_s24 = smov (!%p337_p10), 64   ;;  %s373_s28 = sand.u32 (!%p337_p10), 1, %s5140_s14  }
  0x15   : > { %s4460_s19 = sshll.u32 (!%p337_p10), %s5148_s16, 7  ;;  %s5161_s29 = smov (!%p337_p10), [#allocation3]  }
  0x16   : > { %s5084_s30 = sshll.u32 (!%p337_p10), %s5161_s29, 4  ;;  %s5085_s30 = int_to_ptr.vmem [resolvable:$false] %s5084_s30 }
  0x18   : > { %v426_v0 = vld [vmem:[%s6373_s4 + $0x128] sm:$0xff]  ;;  %v425_v1 = vld [vmem:[%s6373_s4 + $0x120] sm:$0xff]  ;;  %v5158_v4 = vmov 0.0   ;;  %s5290_s27 = scalar_select %p376_p11, %s5148_s16, 1  ;;  %vm501_vm0 = vcmask 261120   ;;  %v963_v26 = vld [vmem:[%s6371_s2 + $0x98] sm:$0xff]  ;;  %v441_v42 = vlaneseq }
  0x19   : > { %v414_v2 = vld [vmem:[%s6373_s4 + $0xc8] sm:$0xff]  ;;  %529 = vmatprep.subr.mxu0 %v426_v0  ;;  %v413_v3 = vld [vmem:[%s6373_s4 + $0xc0] sm:$0xff]  ;;  %569 = vmatprep.mubr.f32.mxu0 %v5158_v4  ;;  %v962_v27 = vld [vmem:[%s6371_s2 + $0x90] sm:$0xff]  ;;  %vm5159_vm1 = vmmov 0   ;;  %vm1219_vm2 = vcmask 523264   ;;  %vm1303_vm3 = vcmask 64512  }
  0x1a   : > { %530 = vmatpush1.msra.mxu0 %v425_v1  ;;  %v402_v5 = vld [vmem:[%s6373_s4 + $0x68] sm:$0xff]  ;;  %640 = vmatprep.mubr.f32.mxu1 %v5158_v4  ;;  %v401_v6 = vld [vmem:[%s6373_s4 + $0x60] sm:$0xff]  ;;  %s4385_s12 = sshll.u32 %s5290_s27, 3  ;;  %v951_v30 = vld [vmem:[%s6371_s2 + $0x38] sm:$0xff]  ;;  %v5424_v43 = vshrl.u32 %v441_v42, 7  ;;  %s5086_s16 = scalar_lea.vmem %s5085_s30, 256 }
  0x1b   : > { %531 = vmatprep.subr.mxu0 %v414_v2  ;;  %v390_v7 = vld [vmem:[%s6373_s4 + $0x8] sm:$0xff]  ;;  %v389_v8 = vld [vmem:[%s6373_s4] sm:$0xff]  ;;  %s5306_s21 = scalar_lea.vmem %s6388_s0, %s4385_s12  ;;  %v950_v31 = vld [vmem:[%s6371_s2 + $0x30] sm:$0xff]  ;;  %s6381_s0 = smov 64  }
  0x1c   : > { %532 = vmatpush1.msra.mxu0 %v413_v3  ;;  %v5309_v9 = vld [vmem:[%s5306_s21] sm:$0xff]  ;;  %v430_v10 = vld [vmem:[%s6373_s4 + $0x148] sm:$0xff]  ;;  %v967_v34 = vld [vmem:[%s6371_s2 + $0xb8] sm:$0xff]  ;;  %v5427_v44 = vsub.s32 0, %v5424_v43  ;;  %v5449_v52 = vsub.s32 1, %v5424_v43  ;;  %s5537_s12 = scalar_lea.vmem %s6389_s1, %s5290_s27  ;;  %s4288_s1 = scalar_lea.sflag [#allocation4], %s373_s28 }
  0x1d   : > { %533 = vmatprep.subr.mxu0 %v402_v5  ;;  %v429_v11 = vld [vmem:[%s6373_s4 + $0x140] sm:$0xff]  ;;  %v418_v12 = vld [vmem:[%s6373_s4 + $0xe8] sm:$0xff]  ;;  %v966_v35 = vld [vmem:[%s6371_s2 + $0xb0] sm:$0xff] }
  0x1e   : > { %534 = vmatpush1.msra.mxu0 %v401_v6  ;;  %v417_v13 = vld [vmem:[%s6373_s4 + $0xe0] sm:$0xff]  ;;  %v406_v14 = vld [vmem:[%s6373_s4 + $0x88] sm:$0xff]  ;;  %v955_v38 = vld [vmem:[%s6371_s2 + $0x58] sm:$0xff] }
  0x1f   : > { %535 = vmatprep.subr.mxu0 %v390_v7  ;;  %v405_v15 = vld [vmem:[%s6373_s4 + $0x80] sm:$0xff]  ;;  %v394_v16 = vld [vmem:[%s6373_s4 + $0x28] sm:$0xff]  ;;  %v954_v39 = vld [vmem:[%s6371_s2 + $0x50] sm:$0xff] }
  0x20   : > { %536 = vmatpush1.msra.mxu0 %v389_v8  ;;  %v393_v17 = vld [vmem:[%s6373_s4 + $0x20] sm:$0xff]  ;;  %v434_v18 = vld [vmem:[%s6373_s4 + $0x168] sm:$0xff]  ;;  %v428_v62 = vld [vmem:[%s6373_s4 + $0x138] sm:$0xff] }
  0x21   : > { %4386 = vmatmul.mubr.msk.f32.vlgmr.msra.gmra.mxu0 %vm501_vm0, %v5309_v9  ;;  %671 = vmatprep.subr.mxu0 %v430_v10  ;;  %v433_v19 = vld [vmem:[%s6373_s4 + $0x160] sm:$0xff]  ;;  %v422_v20 = vld [vmem:[%s6373_s4 + $0x108] sm:$0xff]  ;;  %v427_v63 = vld [vmem:[%s6373_s4 + $0x130] sm:$0xff] }
  0x22   : > { %672 = vmatpush1.msra.mxu0 %v429_v11  ;;  %711 = vmatprep.mubr.f32.mxu0 %v5158_v4  ;;  %v421_v21 = vld [vmem:[%s6373_s4 + $0x100] sm:$0xff]  ;;  %v410_v22 = vld [vmem:[%s6373_s4 + $0xa8] sm:$0xff]  ;;  %v416_v0 = vld [vmem:[%s6373_s4 + $0xd8] sm:$0xff] }
  0x23   : > { %673 = vmatprep.subr.mxu0 %v418_v12  ;;  %v409_v23 = vld [vmem:[%s6373_s4 + $0xa0] sm:$0xff]  ;;  %v398_v24 = vld [vmem:[%s6373_s4 + $0x48] sm:$0xff]  ;;  %600 = vmatprep.subr.mxu1 %v428_v62  ;;  %v415_v1 = vld [vmem:[%s6373_s4 + $0xd0] sm:$0xff] }
  0x24   : > { %674 = vmatpush1.msra.mxu0 %v417_v13  ;;  %v397_v25 = vld [vmem:[%s6373_s4 + $0x40] sm:$0xff]  ;;  %v957_v28 = vld [vmem:[%s6371_s2 + $0x68] sm:$0xff]  ;;  %601 = vmatpush1.msra.mxu1 %v427_v63  ;;  %v404_v2 = vld [vmem:[%s6373_s4 + $0x78] sm:$0xff] }
  0x25   : > { %675 = vmatprep.subr.mxu0 %v406_v14  ;;  %v956_v29 = vld [vmem:[%s6371_s2 + $0x60] sm:$0xff]  ;;  %v945_v32 = vld [vmem:[%s6371_s2 + $0x8] sm:$0xff]  ;;  %602 = vmatprep.subr.mxu1 %v416_v0  ;;  %v403_v3 = vld [vmem:[%s6373_s4 + $0x70] sm:$0xff] }
  0x26   : > { %676 = vmatpush1.msra.mxu0 %v405_v15  ;;  %v944_v33 = vld [vmem:[%s6371_s2] sm:$0xff]  ;;  %v961_v36 = vld [vmem:[%s6371_s2 + $0x88] sm:$0xff]  ;;  %603 = vmatpush1.msra.mxu1 %v415_v1  ;;  %v392_v5 = vld [vmem:[%s6373_s4 + $0x18] sm:$0xff] }
  0x27   : > { %677 = vmatprep.subr.mxu0 %v394_v16  ;;  %v960_v37 = vld [vmem:[%s6371_s2 + $0x80] sm:$0xff]  ;;  %v949_v40 = vld [vmem:[%s6371_s2 + $0x28] sm:$0xff]  ;;  %604 = vmatprep.subr.mxu1 %v404_v2  ;;  %v391_v6 = vld [vmem:[%s6373_s4 + $0x10] sm:$0xff] }
  0x28   : > { %678 = vmatpush1.msra.mxu0 %v393_v17  ;;  %v948_v41 = vld [vmem:[%s6371_s2 + $0x20] sm:$0xff]  ;;  %v5446_v51 = vld [vmem:[%s6374_s5 + $0x8] sm:$0xf]  ;;  %605 = vmatpush1.msra.mxu1 %v403_v3  ;;  %v432_v7 = vld [vmem:[%s6373_s4 + $0x158] sm:$0xff] }
  0x29   : > { %4388 = vmatmul.mubr.msk.f32.vlgmr.msra.gmra.mxu0 %vm501_vm0, %v5309_v9  ;;  %813 = vmatprep.subr.mxu0 %v434_v18  ;;  %v5432_v45 = vld [vmem:[%s6374_s5] sm:$0xff]  ;;  %v480_v54 = vrot.slane %v5446_v51, %v5449_v52  ;;  %v431_v8 = vld [vmem:[%s6373_s4 + $0x150] sm:$0xff]  ;;  %v420_v10 = vld [vmem:[%s6373_s4 + $0xf8] sm:$0xff] }
  0x2a   : > { %814 = vmatpush1.msra.mxu0 %v433_v19  ;;  %853 = vmatprep.mubr.f32.mxu0 %v5158_v4  ;;  %v444_v46 = vrot.slane %v5432_v45, %v5427_v44  ;;  %v5460_v57 = vld [vmem:[%s6372_s3] sm:$0x3f]  ;;  %v419_v11 = vld [vmem:[%s6373_s4 + $0xf0] sm:$0xff]  ;;  %v408_v14 = vld [vmem:[%s6373_s4 + $0x98] sm:$0xff] }
  0x2b   : > { %815 = vmatprep.subr.mxu0 %v422_v20  ;;  %v973_v59 = vrot.slane %v5460_v57, %v5427_v44  ;;  %606 = vmatprep.subr.mxu1 %v392_v5  ;;  %v407_v15 = vld [vmem:[%s6373_s4 + $0x90] sm:$0xff]  ;;  %v396_v16 = vld [vmem:[%s6373_s4 + $0x38] sm:$0xff]  ;;  %v953_v62 = vld [vmem:[%s6371_s2 + $0x48] sm:$0xff] }
  0x2c   : > { %816 = vmatpush1.msra.mxu0 %v421_v21  ;;  %607 = vmatpush1.msra.mxu1 %v391_v6  ;;  %v395_v17 = vld [vmem:[%s6373_s4 + $0x30] sm:$0xff]  ;;  %v5542_v21 = vld [vmem:[%s5537_s12] ss:$0 sm:$0xff]  ;;  %v400_v42 = vld [vmem:[%s6373_s4 + $0x58] sm:$0xff] }
  0x2d   : > { %817 = vmatprep.subr.mxu0 %v410_v22  ;;  %742 = vmatprep.subr.mxu1 %v432_v7  ;;  %v952_v0 = vld [vmem:[%s6371_s2 + $0x40] sm:$0xff]  ;;  %v947_v1 = vld [vmem:[%s6371_s2 + $0x18] sm:$0xff]  ;;  %v946_v3 = vld [vmem:[%s6371_s2 + $0x10] sm:$0xff] }
  0x2e   : > { %818 = vmatpush1.msra.mxu0 %v409_v23  ;;  %4387 = vmatmul.mubr.msk.f32.vlgmr.msra.gmra.mxu1 %vm501_vm0, %v5309_v9 }
  0x2f   : > { %819 = vmatprep.subr.mxu0 %v398_v24  ;;  %743 = vmatpush1.msra.mxu1 %v431_v8 }
  0x30   : > { %820 = vmatpush1.msra.mxu0 %v397_v25  ;;  %782 = vmatprep.mubr.f32.mxu1 %v5158_v4 }
  0x31   : > { %4390 = vmatmul.mubr.msk.f32.vlgmr.msra.gmra.mxu0 %vm501_vm0, %v5309_v9  ;;  %1028 = vmatprep.subr.mxu0 %v963_v26 }
  0x32   : > { %1029 = vmatpush1.msra.mxu0 %v962_v27  ;;  %1068 = vmatprep.mubr.f32.mxu0 %v5158_v4 }
  0x33   : > { %1030 = vmatprep.subr.mxu0 %v957_v28  ;;  %744 = vmatprep.subr.mxu1 %v420_v10 }
  0x34   : > { %1031 = vmatpush1.msra.mxu0 %v956_v29  ;;  %745 = vmatpush1.msra.mxu1 %v419_v11 }
  0x35   : > { %1032 = vmatprep.subr.mxu0 %v951_v30  ;;  %746 = vmatprep.subr.mxu1 %v408_v14 }
  0x36   : > { %1033 = vmatpush1.msra.mxu0 %v950_v31  ;;  %747 = vmatpush1.msra.mxu1 %v407_v15 }
  0x37   : > { %1034 = vmatprep.subr.mxu0 %v945_v32  ;;  %748 = vmatprep.subr.mxu1 %v396_v16 }
  0x38   : > { %1035 = vmatpush1.msra.mxu0 %v944_v33  ;;  %749 = vmatpush1.msra.mxu1 %v395_v17  ;;  %v436_v33 = vld [vmem:[%s6373_s4 + $0x178] sm:$0xff] }
  0x39   : > { %4392 = vmatmul.mubr.msk.f32.vlgmr.msra.gmra.mxu0 %vm501_vm0, %v5309_v9  ;;  %1170 = vmatprep.subr.mxu0 %v967_v34  ;;  %v1580_v17 = vld [vmem:[%s6375_s6 + $0x78] sm:$0xff] }
  0x3a   : > { %1171 = vmatpush1.msra.mxu0 %v966_v35  ;;  %1210 = vmatprep.mubr.f32.mxu0 %v5158_v4 }
  0x3b   : > { %1172 = vmatprep.subr.mxu0 %v961_v36  ;;  %4389 = vmatmul.mubr.msk.f32.vlgmr.msra.gmra.mxu1 %vm501_vm0, %v5309_v9 }
  0x3c   : > { %1173 = vmatpush1.msra.mxu0 %v960_v37  ;;  %924 = vmatprep.mubr.f32.mxu1 %v5158_v4  ;;  %v435_v37 = vld [vmem:[%s6373_s4 + $0x170] sm:$0xff] }
  0x3d   : > { %1174 = vmatprep.subr.mxu0 %v955_v38  ;;  %884 = vmatprep.subr.mxu1 %v436_v33  ;;  %v424_v38 = vld [vmem:[%s6373_s4 + $0x118] sm:$0xff] }
  0x3e   : > { %1175 = vmatpush1.msra.mxu0 %v954_v39  ;;  %885 = vmatpush1.msra.mxu1 %v435_v37  ;;  %v423_v39 = vld [vmem:[%s6373_s4 + $0x110] sm:$0xff]  ;;  %v1398_v37 = vld [vmem:[%s6375_s6 + $0x28] sm:$0xff] }
  0x3f   : > { %1176 = vmatprep.subr.mxu0 %v949_v40  ;;  %886 = vmatprep.subr.mxu1 %v424_v38  ;;  %v412_v40 = vld [vmem:[%s6373_s4 + $0xb8] sm:$0xff]  ;;  %v1397_v38 = vld [vmem:[%s6375_s6 + $0x20] sm:$0xff] }
  0x40   : > { %1177 = vmatpush1.msra.mxu0 %v948_v41  ;;  %887 = vmatpush1.msra.mxu1 %v423_v39  ;;  %v411_v41 = vld [vmem:[%s6373_s4 + $0xb0] sm:$0xff]  ;;  %v1396_v39 = vld [vmem:[%s6375_s6 + $0x18] sm:$0xff] }
  0x41   : > { %4619 = vmatprep.subr.mxu0 %v5158_v4  ;;  %4394 = vmatmul.mubr.msk.f32.vlgmr.msra.gmra.mxu0 %vm501_vm0, %v5309_v9 }
  0x42   : > { %4621 = vmatprep.mubr.msk.f32.mxu0 %vm5159_vm1, %v5158_v4  ;;  %888 = vmatprep.subr.mxu1 %v412_v40  ;;  %v1395_v40 = vld [vmem:[%s6375_s6 + $0x10] sm:$0xff] }
  0x43   : > { %889 = vmatpush1.msra.mxu1 %v411_v41  ;;  %v1394_v41 = vld [vmem:[%s6375_s6 + $0x8] sm:$0xff] }
  0x44   : > { %890 = vmatprep.subr.mxu1 %v400_v42  ;;  %v1393_v42 = vld [vmem:[%s6375_s6] sm:$0xff] }
  0xe1   : > { %v571_v47 = vpop.f32.mrf.mxu0 }
  0xe2   : > { %v572_v48 = vadd.f32 %v571_v47, %v444_v46  ;;  %v399_v46 = vld [vmem:[%s6373_s4 + $0x50] sm:$0xff]  ;;  %v965_v47 = vld [vmem:[%s6371_s2 + $0xa8] sm:$0xff] }
  0xe3   : > { %v5439_v49 = vpop.f32.mrf.mxu0  ;;  %891 = vmatpush1.msra.mxu1 %v399_v46 }
  0xe4   : > { %1403 = vrot.lane.b32.xlu0 %v572_v48, %s6381_s0  ;;  %4620 = vmatpush3.xpose.msk.msra.mxu0 %vm1219_vm2, %v572_v48  ;;  %v467_v48 = vsub.s32 6, %v5424_v43 }
  0xe5   : > { %4629 = vmatprep.subr.mxu0 %v5158_v4  ;;  %1099 = vmatprep.subr.mxu1 %v965_v47 }
  0xe6   : > { %4391 = vmatmul.mubr.msk.f32.vlgmr.msra.gmra.mxu1 %vm501_vm0, %v5309_v9 }
  0xe7   : > { %1139 = vmatprep.mubr.f32.mxu1 %v5158_v4 }
  0xe9   : > { %v5441_v50 = vpop.f32.mrf.mxu0 }
  0xeb   : > { %v5451_v53 = vpop.f32.mrf.mxu0 }
  0xf1   : > { %v5455_v55 = vpop.f32.mrf.mxu0 }
  0xf3   : > { %v857_v56 = vpop.f32.mrf.mxu0 }
  0xf4   : > { %v5462_v58 = vadd.f32 %v857_v56, %v480_v54  ;;  %v5578_v54 = vpop.f32.mrf.mxu1  ;;  %v964_v56 = vld [vmem:[%s6371_s2 + $0xa0] sm:$0xff] }
  0xf5   : > { %1100 = vmatpush1.msra.mxu1 %v964_v56  ;;  %v471_v56 = vsub.s32 7, %v5424_v43 }
  0xf6   : > { %v5596_v63 = vpop.f32.mrf.mxu1 }
  0xf9   : > { %v1070_v60 = vpop.f32.mrf.mxu0 }
  0xfa   : > { %v1071_v61 = vadd.f32 %v1070_v60, %v973_v59  ;;  %v959_v59 = vld [vmem:[%s6371_s2 + $0x78] sm:$0xff]  ;;  %v958_v60 = vld [vmem:[%s6371_s2 + $0x70] sm:$0xff] }
  0xfb   : > { %v5526_v18 = vpop.f32.mrf.mxu0  ;;  %1101 = vmatprep.subr.mxu1 %v959_v59  ;;  %v784_v2 = vpop.f32.mrf.mxu1 }
  0xfc   : > { %1401 = vrot.lane.b32.xlu0 %v1071_v61, %s6381_s0  ;;  %4622 = vmatmul.mubr.msk.f32.vlgmr.msra.gmra.mxu0 %vm1219_vm2, %v1071_v61  ;;  %v468_v61 = vrot.slane %v5432_v45, %v467_v48  ;;  %s4384_s0 = sshll.u32 %s373_s28, 3 }
  0xfd   : > { %4631 = vmatprep.mubr.msk.f32.mxu0 %vm5159_vm1, %v5158_v4  ;;  %1102 = vmatpush1.msra.mxu1 %v958_v60  ;;  %v786_v46 = vpop.f32.mrf.mxu1  ;;  %v472_v60 = vrot.slane %v5432_v45, %v471_v56  ;;  %s375_s20 = scalar_lea.vmem [#allocation3], %s4384_s0 }
  0xfe   : > { %1103 = vmatprep.subr.mxu1 %v953_v62  ;;  %v785_v5 = vadd.f32 %v784_v2, %v468_v61  ;;  %v448_v2 = vrot.slane %v5432_v45, %v5449_v52  ;;  %s4302_s27 = sshll.u32 %s375_s20, 4  ;;  %s4303_s27 = int_to_ptr.vmem [resolvable:$true] %s4302_s27 }
  0xff   : > { %1104 = vmatpush1.msra.mxu1 %v952_v0  ;;  %v5699_v62 = vadd.f32 %v786_v46, %v472_v60  ;;  %p5087_p1 = scmp.lt.s32.totalorder %s4303_s27, %s5085_s30 }
 0x100   : > { %1105 = vmatprep.subr.mxu1 %v947_v1 }
 0x101   : > { %v5528_v19 = vpop.f32.mrf.mxu0  ;;  %1106 = vmatpush1.msra.mxu1 %v946_v3  ;;  %v977_v3 = vrot.slane %v5460_v57, %v5449_v52 }
 0x102   : > { %4624 = vmatprep.subr.mxu1 %v5158_v4  ;;  %4393 = vmatmul.mubr.msk.f32.vlgmr.msra.gmra.mxu1 %vm501_vm0, %v5309_v9 }
 0x103   : > { %v5539_v20 = vpop.f32.mrf.mxu0  ;;  %4625 = vmatpush3.msra.mxu1 %v785_v5  ;;  %4626 = vmatprep.mubr.msk.f32.mxu1 %vm5159_vm1, %v5158_v4 }
 0x104   : > { %4634 = vmatprep.subr.mxu1 %v5158_v4 }
 0x156   : > { %v1404_v12 = vpop.permute.xlu0 %1403 }
 0x157   : > { %4630 = vmatpush3.xpose.msk.msra.mxu0 %vm1219_vm2, %v1404_v12 }
 0x158   : > { %4639 = vmatprep.subr.mxu0 %v5158_v4 }
 0x16e   : > { %v1402_v13 = vpop.permute.xlu0 %1401 }
 0x16f   : > { %4632 = vmatmul.mubr.msk.f32.vlgmr.msra.gmra.mxu0 %vm1219_vm2, %v1402_v13 }
 0x170   : > { %4655 = vmatprep.mubr.msk.f32.mxu0 %vm5159_vm1, %v5158_v4  ;;  %4640 = vmatpush3.msra.mxu0 %v1580_v17 }
 0x171   : > { %4641 = vmatprep.subr.mxu0 %v5158_v4 }
 0x1a6   : > { %v5689_v47 = vpop.f32.mrf.mxu1 }
 0x1a8   : > { %v5691_v48 = vpop.f32.mrf.mxu1 }
 0x1bc   : > { %v1292_v22 = vpop.f32.mrf.mxu0 }
 0x1bd   : > { %v1302_v23 = vmul.f32 %v5542_v21, %v1292_v22  ;;  %v1579_v22 = vld [vmem:[%s6375_s6 + $0x70] sm:$0xff] }
 0x1be   : > { %v4623_v24 = vpop.f32.mrf.mxu0  ;;  %4642 = vmatpush3.msra.mxu0 %v1579_v22 }
 0x1bf   : > { %v1304_v25 = vsel %vm1303_vm3, %v1302_v23, -inf  ;;  %4643 = vmatprep.subr.mxu0 %v5158_v4  ;;  %v1577_v24 = vld [vmem:[%s6375_s6 + $0x60] sm:$0xff] }
 0x1c0   : > { %1305 = vmax.xlane.f32.xlu1 %v1304_v25  ;;  %v1576_v25 = vld [vmem:[%s6375_s6 + $0x58] sm:$0xff] }
 0x1c2   : > { %v5694_v59 = vpop.f32.mrf.mxu1 }
 0x1c4   : > { %v5697_v61 = vpop.f32.mrf.mxu1 }
 0x22f   : > { %v1475_v26 = vpop.f32.mrf.mxu0 }
 0x230   : > { %v1479_v27 = vmul.f32 %v5542_v21, %v1475_v26  ;;  %v1575_v26 = vld [vmem:[%s6375_s6 + $0x50] sm:$0xff] }
 0x231   : > { %v4633_v28 = vpop.f32.mrf.mxu0 }
 0x232   : > { %v1480_v29 = vsel %vm1303_vm3, %v1479_v27, -inf  ;;  %v1573_v28 = vld [vmem:[%s6375_s6 + $0x40] sm:$0xff] }
 0x233   : > { %1481 = vmax.xlane.f32.xlu1 %v1480_v29 }
 0x249   : > { %v1306_v30 = vpop.xlane.xlu1 %1305 }
 0x24a   : > { %v1307_v31 = vsub.f32 %v1302_v23, %v1306_v30  ;;  %v1578_v23 = vld [vmem:[%s6375_s6 + $0x68] sm:$0xff] }
 0x24b   : > { %4644 = vmatpush3.msra.mxu0 %v1578_v23 }
 0x24c   : > { %v1308_v32 = vmul.f32 1.442695, %v1307_v31  ;;  %4645 = vmatprep.subr.mxu0 %v5158_v4 }
 0x24d   : > { %4646 = vmatpush3.msra.mxu0 %v1577_v24  ;;  %v1902_v24 = vld [vmem:[%s6375_s6 + $0xb8] sm:$0xff] }
 0x24e   : > { %5025 = vpow2.f32 %v1308_v32  ;;  %4647 = vmatprep.subr.mxu0 %v5158_v4 }
 0x24f   : > { %4648 = vmatpush3.msra.mxu0 %v1576_v25  ;;  %v1901_v25 = vld [vmem:[%s6375_s6 + $0xb0] sm:$0xff] }
 0x250   : > { %4649 = vmatprep.subr.mxu0 %v5158_v4 }
 0x251   : > { %4650 = vmatpush3.msra.mxu0 %v1575_v26  ;;  %v1900_v26 = vld [vmem:[%s6375_s6 + $0xa8] sm:$0xff] }
 0x252   : > { %4651 = vmatprep.subr.mxu0 %v5158_v4 }
 0x25b   : > { %v5026_v34 = vpop.eup %5025 }
 0x25c   : > { %v1310_v35 = vmul.f32 %v5026_v34, %v5542_v21 }
 0x25e   : > { %v1311_v36 = vsel %vm1303_vm3, %v1310_v35, 0.0 }
 0x25f   : > { %1312 = vadd.xlane.f32.xlu0 %v1311_v36  ;;  %v1399_v36 = vld [vmem:[%s6375_s6 + $0x30] sm:$0xff] }
 0x2bc   : > { %v1482_v6 = vpop.xlane.xlu1 %1481 }
 0x2bd   : > { %v1483_v7 = vsub.f32 %v1479_v27, %v1482_v6  ;;  %v1574_v27 = vld [vmem:[%s6375_s6 + $0x48] sm:$0xff] }
 0x2be   : > { %4652 = vmatpush3.msra.mxu0 %v1574_v27  ;;  %v1899_v27 = vld [vmem:[%s6375_s6 + $0xa0] sm:$0xff] }
 0x2bf   : > { %v1484_v8 = vmul.f32 1.442695, %v1483_v7  ;;  %4653 = vmatprep.subr.mxu0 %v5158_v4 }
 0x2c0   : > { %4654 = vmatpush3.msra.mxu0 %v1573_v28  ;;  %v1898_v28 = vld [vmem:[%s6375_s6 + $0x98] sm:$0xff] }
 0x2c1   : > { %5027 = vpow2.f32 %v1484_v8  ;;  %4677 = vmatprep.subr.mxu0 %v5158_v4  ;;  %v1073_v8 = vadd.f32 %v5526_v18, %v977_v3 }
 0x2ce   : > { %v5028_v10 = vpop.eup %5027 }
 0x2cf   : > { %v1486_v11 = vmul.f32 %v5028_v10, %v5542_v21 }
 0x2d1   : > { %v1487_v12 = vsel %vm1303_vm3, %v1486_v11, 0.0 }
 0x2d2   : > { %1488 = vadd.xlane.f32.xlu1 %v1487_v12 }
 0x2e3   : > { %1497 = vrot.lane.b32.xlu1 %v785_v5, %s6390_s24  ;;  %v574_v5 = vadd.f32 %v5439_v49, %v448_v2 }
 0x2e8   : > { %v1313_v13 = vpop.xlane.xlu0 %1312 }
 0x2e9   : > { %vm1314_vm4 = vcmp.eq.f32.partialorder %v1313_v13, 0.0 }
 0x2ea   : > { %v4398_v9 = vsel %vm1314_vm4, 1.0, %v5158_v4 }
 0x2eb   : > { %v1317_v14 = vadd.f32 %v4398_v9, %v1313_v13 }
 0x2ed   : > { %5029 = vrcp.f32 %v1317_v14 }
 0x2fa   : > { %v5030_v15 = vpop.eup %5029 }
 0x2fb   : > { %v1319_v16 = vmul.f32 %v5030_v15, %v1310_v35  ;;  %v1400_v35 = vld [vmem:[%s6375_s6 + $0x38] sm:$0xff] }
 0x2fd   : > { %4627 = vmatmul.mubr.msk.f32.vlgmr.msra.gmra.mxu1 %vm1303_vm3, %v1319_v16 }
 0x2fe   : > { %4636 = vmatprep.mubr.msk.f32.mxu1 %vm5159_vm1, %v5158_v4 }
 0x35b   : > { %v1489_v29 = vpop.xlane.xlu1 %1488 }
 0x35c   : > { %vm1490_vm5 = vcmp.eq.f32.partialorder %v1489_v29, 0.0 }
 0x35d   : > { %v4402_v30 = vsel %vm1490_vm5, 1.0, %v5158_v4 }
 0x35e   : > { %v1493_v31 = vadd.f32 %v4402_v30, %v1489_v29  ;;  %v1897_v29 = vld [vmem:[%s6375_s6 + $0x90] sm:$0xff]  ;;  %v1896_v30 = vld [vmem:[%s6375_s6 + $0x88] sm:$0xff] }
 0x35f   : > { %v1498_v32 = vpop.permute.xlu1 %1497 }
 0x360   : > { %5031 = vrcp.f32 %v1493_v31  ;;  %4635 = vmatpush3.msra.mxu1 %v1498_v32  ;;  %v1895_v31 = vld [vmem:[%s6375_s6 + $0x80] sm:$0xff] }
 0x361   : > { %4658 = vmatprep.subr.mxu1 %v5158_v4 }
 0x36d   : > { %v5032_v33 = vpop.eup %5031 }
 0x36e   : > { %v1495_v34 = vmul.f32 %v5032_v33, %v1486_v11 }
 0x370   : > { %4637 = vmatmul.mubr.msk.f32.vlgmr.msra.gmra.mxu1 %vm1303_vm3, %v1495_v34 }
 0x371   : > { %4659 = vmatpush3.msra.mxu1 %v1400_v35  ;;  %4674 = vmatprep.mubr.msk.f32.mxu1 %vm5159_vm1, %v5158_v4 }
 0x372   : > { %4660 = vmatprep.subr.mxu1 %v5158_v4 }
 0x373   : > { %4661 = vmatpush3.msra.mxu1 %v1399_v36 }
 0x374   : > { %4662 = vmatprep.subr.mxu1 %v5158_v4 }
 0x375   : > { %4663 = vmatpush3.msra.mxu1 %v1398_v37 }
 0x376   : > { %4664 = vmatprep.subr.mxu1 %v5158_v4 }
 0x377   : > { %4665 = vmatpush3.msra.mxu1 %v1397_v38 }
 0x378   : > { %4666 = vmatprep.subr.mxu1 %v5158_v4 }
 0x379   : > { %4667 = vmatpush3.msra.mxu1 %v1396_v39  ;;  %v5772_v39 = vsub.s32 2, %v5424_v43 }
 0x37a   : > { %4668 = vmatprep.subr.mxu1 %v5158_v4 }
 0x37b   : > { %4669 = vmatpush3.msra.mxu1 %v1395_v40  ;;  %v452_v40 = vrot.slane %v5432_v45, %v5772_v39 }
 0x37c   : > { %4670 = vmatprep.subr.mxu1 %v5158_v4 }
 0x37d   : > { %4671 = vmatpush3.msra.mxu1 %v1394_v41  ;;  %v981_v41 = vrot.slane %v5460_v57, %v5772_v39  ;;  %v643_v46 = vadd.f32 %v5578_v54, %v452_v40 }
 0x37e   : > { %4672 = vmatprep.subr.mxu1 %v5158_v4 }
 0x37f   : > { %4673 = vmatpush3.msra.mxu1 %v1393_v42  ;;  %v476_v42 = vrot.slane %v5446_v51, %v5427_v44 }
 0x380   : > { %4682 = vmatprep.subr.mxu1 %v5158_v4 }
 0x3bd   : > { %v1389_v0 = vpop.f32.mrf.mxu1 }
 0x3be   : > { %4675 = vmatmul.mubr.msk.f32.vlgmr.msra.gmra.mxu1 %vm1219_vm2, %v1389_v0  ;;  %v1142_v0 = vadd.f32 %v5694_v59, %v981_v41 }
 0x3bf   : > { %4683 = vmatpush3.msra.mxu1 %v5699_v62  ;;  %v4628_v1 = vpop.f32.mrf.mxu1  ;;  %4684 = vmatprep.mubr.msk.f32.mxu1 %vm5159_vm1, %v5158_v4 }
 0x3c0   : > { %4706 = vmatprep.subr.mxu1 %v5158_v4  ;;  %v5788_v1 = vadd.f32 %v5455_v55, %v476_v42 }
 0x430   : > { %v1569_v6 = vpop.f32.mrf.mxu1 }
 0x431   : > { %4656 = vmatmul.mubr.msk.f32.vlgmr.msra.gmra.mxu0 %vm1219_vm2, %v1569_v6 }
 0x432   : > { %4678 = vmatpush3.xpose.msk.msra.mxu0 %vm1219_vm2, %v574_v5  ;;  %v4638_v7 = vpop.f32.mrf.mxu1  ;;  %4679 = vmatprep.mubr.msk.f32.mxu0 %vm5159_vm1, %v5158_v4 }
 0x433   : > { %4687 = vmatprep.subr.mxu0 %v5158_v4 }
 0x435   : > { %4680 = vmatmul.mubr.msk.f32.vlgmr.msra.gmra.mxu0 %vm1219_vm2, %v1073_v8 }
 0x436   : > { %4703 = vmatprep.mubr.msk.f32.mxu0 %vm5159_vm1, %v5158_v4  ;;  %4688 = vmatpush3.msra.mxu0 %v1902_v24 }
 0x437   : > { %4689 = vmatprep.subr.mxu0 %v5158_v4 }
 0x438   : > { %4690 = vmatpush3.msra.mxu0 %v1901_v25  ;;  %v2156_v25 = vld [vmem:[%s6375_s6 + $0xf8] sm:$0xff] }
 0x439   : > { %4691 = vmatprep.subr.mxu0 %v5158_v4 }
 0x43a   : > { %4692 = vmatpush3.msra.mxu0 %v1900_v26  ;;  %v2153_v26 = vld [vmem:[%s6375_s6 + $0xe0] sm:$0xff] }
 0x43b   : > { %4693 = vmatprep.subr.mxu0 %v5158_v4 }
 0x43c   : > { %4694 = vmatpush3.msra.mxu0 %v1899_v27  ;;  %v2152_v27 = vld [vmem:[%s6375_s6 + $0xd8] sm:$0xff] }
 0x43d   : > { %4695 = vmatprep.subr.mxu0 %v5158_v4 }
 0x43e   : > { %4696 = vmatpush3.msra.mxu0 %v1898_v28  ;;  %v2151_v28 = vld [vmem:[%s6375_s6 + $0xd0] sm:$0xff] }
 0x43f   : > { %4697 = vmatprep.subr.mxu0 %v5158_v4 }
 0x440   : > { %4698 = vmatpush3.msra.mxu0 %v1897_v29  ;;  %v2150_v29 = vld [vmem:[%s6375_s6 + $0xc8] sm:$0xff] }
 0x441   : > { %4699 = vmatprep.subr.mxu0 %v5158_v4 }
 0x442   : > { %4700 = vmatpush3.msra.mxu0 %v1896_v30  ;;  %v2149_v30 = vld [vmem:[%s6375_s6 + $0xc0] sm:$0xff] }
 0x443   : > { %4701 = vmatprep.subr.mxu0 %v5158_v4 }
 0x444   : > { %4702 = vmatpush3.msra.mxu0 %v1895_v31 }
 0x445   : > { %4735 = vmatprep.subr.mxu0 %v5158_v4 }
 0x47e   : > { %v5720_v52 = vpop.f32.mrf.mxu1 }
 0x480   : > { %v4676_v49 = vpop.f32.mrf.mxu1 }
 0x4f1   : > { %v5722_v10 = vpop.f32.mrf.mxu0 }
 0x4f3   : > { %v4657_v11 = vpop.f32.mrf.mxu0 }
 0x4f5   : > { %v1801_v12 = vpop.f32.mrf.mxu0 }
 0x4f6   : > { %v1805_v13 = vmul.f32 %v5542_v21, %v1801_v12 }
 0x4f7   : > { %v4681_v9 = vpop.f32.mrf.mxu0 }
 0x4f8   : > { %v1806_v14 = vsel %vm1303_vm3, %v1805_v13, -inf }
 0x4f9   : > { %1807 = vmax.xlane.f32.xlu1 %v1806_v14 }
 0x582   : > { %v1808_v18 = vpop.xlane.xlu1 %1807 }
 0x583   : > { %v1809_v15 = vsub.f32 %v1805_v13, %v1808_v18 }
 0x585   : > { %v1810_v16 = vmul.f32 1.442695, %v1809_v15  ;;  %v5809_v15 = vsub.s32 3, %v5424_v43 }
 0x587   : > { %5033 = vpow2.f32 %v1810_v16  ;;  %v456_v16 = vrot.slane %v5432_v45, %v5809_v15  ;;  %v2155_v45 = vld [vmem:[%s6375_s6 + $0xf0] sm:$0xff] }
 0x594   : > { %v5034_v17 = vpop.eup %5033 }
 0x595   : > { %v1812_v22 = vmul.f32 %v5034_v17, %v5542_v21  ;;  %v5814_v17 = vadd.f32 %v5596_v63, %v456_v16  ;;  %v2154_v63 = vld [vmem:[%s6375_s6 + $0xe8] sm:$0xff]  ;;  %v2399_v16 = vld [vmem:[%s6375_s6 + $0x100] sm:$0xff] }
 0x597   : > { %v1813_v23 = vsel %vm1303_vm3, %v1812_v22, 0.0 }
 0x598   : > { %1814 = vadd.xlane.f32.xlu0 %v1813_v23 }
 0x5ae   : > { %1979 = vrot.lane.b32.xlu0 %v574_v5, %s6390_s24 }
 0x5b2   : > { %1977 = vrot.lane.b32.xlu0 %v1073_v8, %s6390_s24 }
 0x621   : > { %v1815_v32 = vpop.xlane.xlu0 %1814 }
 0x622   : > { %vm1816_vm6 = vcmp.eq.f32.partialorder %v1815_v32, 0.0 }
 0x623   : > { %v4408_v33 = vsel %vm1816_vm6, 1.0, %v5158_v4 }
 0x624   : > { %v1819_v34 = vadd.f32 %v4408_v33, %v1815_v32 }
 0x625   : > { %v1980_v36 = vpop.permute.xlu0 %1979 }
 0x626   : > { %5035 = vrcp.f32 %v1819_v34 }
 0x629   : > { %v1978_v38 = vpop.permute.xlu0 %1977 }
 0x633   : > { %v5036_v35 = vpop.eup %5035 }
 0x634   : > { %v1821_v37 = vmul.f32 %v5036_v35, %v1812_v22 }
 0x636   : > { %4685 = vmatmul.mubr.msk.f32.vlgmr.msra.gmra.mxu1 %vm1303_vm3, %v1821_v37 }
 0x637   : > { %4707 = vmatpush3.xpose.msk.msra.mxu1 %vm1219_vm2, %v1980_v36  ;;  %4708 = vmatprep.mubr.msk.f32.mxu1 %vm5159_vm1, %v5158_v4 }
 0x638   : > { %4711 = vmatprep.subr.mxu1 %v5158_v4 }
 0x63a   : > { %4709 = vmatmul.mubr.msk.f32.vlgmr.msra.gmra.mxu1 %vm1219_vm2, %v1978_v38 }
 0x63b   : > { %4713 = vmatprep.mubr.msk.f32.mxu1 %vm5159_vm1, %v5158_v4 }
 0x6f6   : > { %v1891_v56 = vpop.f32.mrf.mxu1 }
 0x6f7   : > { %4704 = vmatmul.mubr.msk.f32.vlgmr.msra.gmra.mxu0 %vm1219_vm2, %v1891_v56 }
 0x6f8   : > { %4736 = vmatpush3.xpose.msk.msra.mxu0 %vm1219_vm2, %v643_v46  ;;  %v4686_v60 = vpop.f32.mrf.mxu1  ;;  %4737 = vmatprep.mubr.msk.f32.mxu0 %vm5159_vm1, %v5158_v4 }
 0x6f9   : > { %4740 = vmatprep.subr.mxu0 %v5158_v4 }
 0x6fa   : > { %v2051_v2 = vpop.f32.mrf.mxu1 }
 0x6fb   : > { %v2055_v44 = vmul.f32 %v5542_v21, %v2051_v2  ;;  %4738 = vmatmul.mubr.msk.f32.vlgmr.msra.gmra.mxu0 %vm1219_vm2, %v1142_v0 }
 0x6fc   : > { %4741 = vmatpush3.msra.mxu0 %v5788_v1  ;;  %v4710_v51 = vpop.f32.mrf.mxu1  ;;  %4742 = vmatprep.mubr.msk.f32.mxu0 %vm5159_vm1, %v5158_v4 }
 0x6fd   : > { %v2056_v54 = vsel %vm1303_vm3, %v2055_v44, -inf  ;;  %4745 = vmatprep.subr.mxu0 %v5158_v4 }
 0x6fe   : > { %2057 = vmax.xlane.f32.xlu1 %v2056_v54 }
 0x70f   : > { %2073 = vrot.lane.b32.xlu1 %v5699_v62, %s6390_s24  ;;  %v1724_v62 = vadd.f32 %v5720_v52, %v5722_v10 }
 0x713   : > { %2483 = vrot.lane.b32.xlu1 %v643_v46, %s6390_s24 }
 0x717   : > { %2481 = vrot.lane.b32.xlu1 %v1142_v0, %s6390_s24 }
 0x787   : > { %v2058_v55 = vpop.xlane.xlu1 %2057 }
 0x788   : > { %v2059_v59 = vsub.f32 %v2055_v44, %v2058_v55 }
 0x78a   : > { %v2060_v3 = vmul.f32 1.442695, %v2059_v59 }
 0x78b   : > { %v2074_v5 = vpop.permute.xlu1 %2073 }
 0x78c   : > { %5037 = vpow2.f32 %v2060_v3  ;;  %4712 = vmatpush3.msra.mxu1 %v2074_v5 }
 0x78d   : > { %4716 = vmatprep.subr.mxu1 %v5158_v4 }
 0x78f   : > { %v2484_v31 = vpop.permute.xlu1 %2483 }
 0x793   : > { %v2482_v34 = vpop.permute.xlu1 %2481 }
 0x799   : > { %v5038_v6 = vpop.eup %5037 }
 0x79a   : > { %v2062_v7 = vmul.f32 %v5038_v6, %v5542_v21 }
 0x79c   : > { %v2063_v8 = vsel %vm1303_vm3, %v2062_v7, 0.0 }
 0x79d   : > { %2064 = vadd.xlane.f32.xlu0 %v2063_v8 }
 0x7b7   : > { %v1972_v49 = vpop.f32.mrf.mxu0 }
 0x7b8   : > { %v1976_v11 = vadd.f32 %v1972_v49, %v1724_v62 }
 0x7b9   : > { %v4705_v12 = vpop.f32.mrf.mxu0 }
 0x7bb   : > { %v2305_v13 = vpop.f32.mrf.mxu0 }
 0x7bc   : > { %v2309_v9 = vmul.f32 %v5542_v21, %v2305_v13  ;;  %v2406_v13 = vld [vmem:[%s6375_s6 + $0x138] sm:$0xff] }
 0x7bd   : > { %v4739_v14 = vpop.f32.mrf.mxu0 }
 0x7be   : > { %v2310_v18 = vsel %vm1303_vm3, %v2309_v9, -inf  ;;  %v2401_v14 = vld [vmem:[%s6375_s6 + $0x110] sm:$0xff] }
 0x7bf   : > { %2311 = vmax.xlane.f32.xlu1 %v2310_v18  ;;  %v2400_v18 = vld [vmem:[%s6375_s6 + $0x108] sm:$0xff] }
 0x7d0   : > { %2987 = vrot.lane.b32.xlu1 %v5814_v17, %s6390_s24 }
 0x826   : > { %v2065_v52 = vpop.xlane.xlu0 %2064 }
 0x827   : > { %vm2066_vm7 = vcmp.eq.f32.partialorder %v2065_v52, 0.0 }
 0x828   : > { %v4413_v10 = vsel %vm2066_vm7, 1.0, %v5158_v4 }
 0x829   : > { %v2069_v22 = vadd.f32 %v4413_v10, %v2065_v52 }
 0x82b   : > { %5039 = vrcp.f32 %v2069_v22 }
 0x838   : > { %v5040_v23 = vpop.eup %5039 }
 0x839   : > { %v2071_v24 = vmul.f32 %v5040_v23, %v2062_v7 }
 0x83b   : > { %4714 = vmatmul.mubr.msk.f32.vlgmr.msra.gmra.mxu1 %vm1303_vm3, %v2071_v24 }
 0x83c   : > { %4717 = vmatpush3.msra.mxu1 %v2156_v25  ;;  %4732 = vmatprep.mubr.msk.f32.mxu1 %vm5159_vm1, %v5158_v4 }
 0x83d   : > { %4718 = vmatprep.subr.mxu1 %v5158_v4 }
 0x83e   : > { %4719 = vmatpush3.msra.mxu1 %v2155_v45  ;;  %v2660_v45 = vld [vmem:[%s6375_s6 + $0x178] sm:$0xff] }
 0x83f   : > { %4720 = vmatprep.subr.mxu1 %v5158_v4 }
 0x840   : > { %4721 = vmatpush3.msra.mxu1 %v2154_v63  ;;  %v2659_v63 = vld [vmem:[%s6375_s6 + $0x170] sm:$0xff] }
 0x841   : > { %4722 = vmatprep.subr.mxu1 %v5158_v4 }
 0x842   : > { %4723 = vmatpush3.msra.mxu1 %v2153_v26  ;;  %v2658_v26 = vld [vmem:[%s6375_s6 + $0x168] sm:$0xff] }
 0x843   : > { %4724 = vmatprep.subr.mxu1 %v5158_v4 }
 0x844   : > { %4725 = vmatpush3.msra.mxu1 %v2152_v27  ;;  %v2657_v27 = vld [vmem:[%s6375_s6 + $0x160] sm:$0xff] }
 0x845   : > { %4726 = vmatprep.subr.mxu1 %v5158_v4 }
 0x846   : > { %4727 = vmatpush3.msra.mxu1 %v2151_v28  ;;  %v2656_v28 = vld [vmem:[%s6375_s6 + $0x158] sm:$0xff] }
 0x847   : > { %4728 = vmatprep.subr.mxu1 %v5158_v4 }
 0x848   : > { %4729 = vmatpush3.msra.mxu1 %v2150_v29  ;;  %v2312_v35 = vpop.xlane.xlu1 %2311  ;;  %v2655_v29 = vld [vmem:[%s6375_s6 + $0x150] sm:$0xff] }
 0x849   : > { %4730 = vmatprep.subr.mxu1 %v5158_v4  ;;  %v2313_v36 = vsub.f32 %v2309_v9, %v2312_v35  ;;  %v2405_v9 = vld [vmem:[%s6375_s6 + $0x130] sm:$0xff] }
 0x84a   : > { %4731 = vmatpush3.msra.mxu1 %v2149_v30  ;;  %v2654_v30 = vld [vmem:[%s6375_s6 + $0x148] sm:$0xff] }
 0x84b   : > { %4764 = vmatprep.subr.mxu1 %v5158_v4  ;;  %v2314_v37 = vmul.f32 1.442695, %v2313_v36 }
 0x84c   : > { %v2988_v35 = vpop.permute.xlu1 %2987 }
 0x84d   : > { %5041 = vpow2.f32 %v2314_v37 }
 0x85a   : > { %v5042_v42 = vpop.eup %5041 }
 0x85b   : > { %v2316_v2 = vmul.f32 %v5042_v42, %v5542_v21 }
 0x85d   : > { %v2317_v44 = vsel %vm1303_vm3, %v2316_v2, 0.0 }
 0x8fb   : > { %v2145_v32 = vpop.f32.mrf.mxu1 }
 0x8fc   : > { %4733 = vmatmul.mubr.msk.f32.vlgmr.msra.gmra.mxu1 %vm1219_vm2, %v2145_v32 }
 0x8fd   : > { %4765 = vmatpush3.xpose.msk.msra.mxu1 %vm1219_vm2, %v2484_v31  ;;  %v4715_v33 = vpop.f32.mrf.mxu1  ;;  %4766 = vmatprep.mubr.msk.f32.mxu1 %vm5159_vm1, %v5158_v4  ;;  %v2653_v31 = vld [vmem:[%s6375_s6 + $0x140] sm:$0xff] }
 0x8fe   : > { %4769 = vmatprep.subr.mxu1 %v5158_v4 }
 0x900   : > { %4767 = vmatmul.mubr.msk.f32.vlgmr.msra.gmra.mxu1 %vm1219_vm2, %v2482_v34 }
 0x901   : > { %4771 = vmatprep.mubr.msk.f32.mxu1 %vm5159_vm1, %v5158_v4 }
 0x9bc   : > { %v2226_v38 = vpop.f32.mrf.mxu1 }
 0x9bd   : > { %v5862_v40 = vadd.f32 %v2226_v38, %v1976_v11  ;;  %v985_v11 = vrot.slane %v5460_v57, %v5809_v15  ;;  %v2404_v57 = vld [vmem:[%s6375_s6 + $0x128] sm:$0xff] }
 0x9be   : > { %v4734_v41 = vpop.f32.mrf.mxu1 }
 0x9bf   : > { %v5879_v12 = vadd.f32 %v5697_v61, %v985_v11  ;;  %v2403_v61 = vld [vmem:[%s6375_s6 + $0x120] sm:$0xff] }
 0x9c0   : > { %v2555_v46 = vpop.f32.mrf.mxu1 }
 0x9c1   : > { %v2559_v56 = vmul.f32 %v5542_v21, %v2555_v46 }
 0x9c2   : > { %v4768_v60 = vpop.f32.mrf.mxu1 }
 0x9c3   : > { %v2560_v0 = vsel %vm1303_vm3, %v2559_v56, -inf }
 0x9c4   : > { %2561 = vmax.xlane.f32.xlu0 %v2560_v0 }
 0x9c8   : > { %2318 = vadd.xlane.f32.xlu0 %v2317_v44 }
 0xa4d   : > { %v2562_v51 = vpop.xlane.xlu0 %2561 }
 0xa4e   : > { %v2563_v54 = vsub.f32 %v2559_v56, %v2562_v51 }
 0xa50   : > { %v2564_v55 = vmul.f32 1.442695, %v2563_v54 }
 0xa51   : > { %v2319_v59 = vpop.xlane.xlu0 %2318 }
 0xa52   : > { %5043 = vpow2.f32 %v2564_v55  ;;  %vm2320_vm8 = vcmp.eq.f32.partialorder %v2319_v59, 0.0 }
 0xa53   : > { %v4418_v3 = vsel %vm2320_vm8, 1.0, %v5158_v4 }
 0xa54   : > { %v2323_v5 = vadd.f32 %v4418_v3, %v2319_v59 }
 0xa56   : > { %5045 = vrcp.f32 %v2323_v5 }
 0xa5f   : > { %v5044_v6 = vpop.eup %5043 }
 0xa60   : > { %v2566_v7 = vmul.f32 %v5044_v6, %v5542_v21 }
 0xa62   : > { %v2567_v8 = vsel %vm1303_vm3, %v2566_v7, 0.0 }
 0xa63   : > { %v5046_v62 = vpop.eup %5045  ;;  %2568 = vadd.xlane.f32.xlu0 %v2567_v8 }
 0xa64   : > { %v2325_v49 = vmul.f32 %v5046_v62, %v2316_v2  ;;  %v459_v62 = vsub.s32 4, %v5424_v43 }
 0xa66   : > { %4743 = vmatmul.mubr.msk.f32.vlgmr.msra.gmra.mxu0 %vm1303_vm3, %v2325_v49  ;;  %v5985_v49 = vld [vmem:[%s6374_s5] sm:$0xff] }
 0xa67   : > { %4761 = vmatprep.mubr.msk.f32.mxu0 %vm5159_vm1, %v5158_v4  ;;  %4746 = vmatpush3.msra.mxu0 %v2406_v13  ;;  %v460_v11 = vrot.slane %v5985_v49, %v459_v62 }
 0xa68   : > { %4747 = vmatprep.subr.mxu0 %v5158_v4 }
 0xa69   : > { %4748 = vmatpush3.msra.mxu0 %v2405_v9 }
 0xa6a   : > { %4749 = vmatprep.subr.mxu0 %v5158_v4 }
 0xa6b   : > { %4750 = vmatpush3.msra.mxu0 %v2404_v57 }
 0xa6c   : > { %4751 = vmatprep.subr.mxu0 %v5158_v4 }
 0xa6d   : > { %4752 = vmatpush3.msra.mxu0 %v2403_v61 }
 0xa6e   : > { %4753 = vmatprep.subr.mxu0 %v5158_v4 }
 0xa79   : > { %2577 = vrot.lane.b32.xlu0 %v5788_v1, %s6390_s24  ;;  %v2402_v1 = vld [vmem:[%s6375_s6 + $0x118] sm:$0xff] }
 0xa7a   : > { %4754 = vmatpush3.msra.mxu0 %v2402_v1 }
 0xa7b   : > { %4755 = vmatprep.subr.mxu0 %v5158_v4 }
 0xa7c   : > { %4756 = vmatpush3.msra.mxu0 %v2401_v14 }
 0xa7d   : > { %2985 = vrot.lane.b32.xlu0 %v5879_v12, %s6390_s24  ;;  %4757 = vmatprep.subr.mxu0 %v5158_v4 }
 0xa7e   : > { %4758 = vmatpush3.msra.mxu0 %v2400_v18 }
 0xa7f   : > { %4759 = vmatprep.subr.mxu0 %v5158_v4 }
 0xa80   : > { %4760 = vmatpush3.msra.mxu0 %v2399_v16 }
 0xa81   : > { %4793 = vmatprep.subr.mxu0 %v5158_v4 }
 0xaec   : > { %v2569_v52 = vpop.xlane.xlu0 %2568 }
 0xaed   : > { %vm2570_vm9 = vcmp.eq.f32.partialorder %v2569_v52, 0.0 }
 0xaee   : > { %v4423_v10 = vsel %vm2570_vm9, 1.0, %v5158_v4 }
 0xaef   : > { %v2573_v22 = vadd.f32 %v4423_v10, %v2569_v52 }
 0xaf0   : > { %v2578_v23 = vpop.permute.xlu0 %2577 }
 0xaf1   : > { %5047 = vrcp.f32 %v2573_v22  ;;  %4770 = vmatpush3.msra.mxu1 %v2578_v23  ;;  %v6002_v22 = vld [vmem:[%s6372_s3] sm:$0x3f] }
 0xaf2   : > { %4774 = vmatprep.subr.mxu1 %v5158_v4  ;;  %v989_v23 = vrot.slane %v6002_v22, %v459_v62 }
 0xaf4   : > { %v2986_v36 = vpop.permute.xlu0 %2985 }
 0xafe   : > { %v5048_v24 = vpop.eup %5047 }
 0xaff   : > { %v2575_v25 = vmul.f32 %v5048_v24, %v2566_v7  ;;  %v2910_v24 = vld [vmem:[%s6375_s6 + $0x1b8] sm:$0xff] }
 0xb01   : > { %4772 = vmatmul.mubr.msk.f32.vlgmr.msra.gmra.mxu1 %vm1303_vm3, %v2575_v25  ;;  %v2909_v25 = vld [vmem:[%s6375_s6 + $0x1b0] sm:$0xff] }
 0xb02   : > { %4775 = vmatpush3.msra.mxu1 %v2660_v45  ;;  %4790 = vmatprep.mubr.msk.f32.mxu1 %vm5159_vm1, %v5158_v4  ;;  %v2906_v45 = vld [vmem:[%s6375_s6 + $0x198] sm:$0xff] }
 0xb03   : > { %4776 = vmatprep.subr.mxu1 %v5158_v4 }
 0xb04   : > { %4777 = vmatpush3.msra.mxu1 %v2659_v63  ;;  %v2905_v63 = vld [vmem:[%s6375_s6 + $0x190] sm:$0xff] }
 0xb05   : > { %4778 = vmatprep.subr.mxu1 %v5158_v4 }
 0xb06   : > { %4779 = vmatpush3.msra.mxu1 %v2658_v26  ;;  %v2904_v26 = vld [vmem:[%s6375_s6 + $0x188] sm:$0xff] }
 0xb07   : > { %4780 = vmatprep.subr.mxu1 %v5158_v4 }
 0xb08   : > { %4781 = vmatpush3.msra.mxu1 %v2657_v27  ;;  %v2903_v27 = vld [vmem:[%s6375_s6 + $0x180] sm:$0xff] }
 0xb09   : > { %4782 = vmatprep.subr.mxu1 %v5158_v4 }
 0xb0a   : > { %4783 = vmatpush3.msra.mxu1 %v2656_v28 }
 0xb0b   : > { %4784 = vmatprep.subr.mxu1 %v5158_v4 }
 0xb0c   : > { %4785 = vmatpush3.msra.mxu1 %v2655_v29 }
 0xb0d   : > { %4786 = vmatprep.subr.mxu1 %v5158_v4 }
 0xb0e   : > { %4787 = vmatpush3.msra.mxu1 %v2654_v30 }
 0xb0f   : > { %4788 = vmatprep.subr.mxu1 %v5158_v4 }
 0xb10   : > { %4789 = vmatpush3.msra.mxu1 %v2653_v31 }
 0xb11   : > { %4822 = vmatprep.subr.mxu1 %v5158_v4 }
 0xb26   : > { %v2395_v32 = vpop.f32.mrf.mxu0 }
 0xb27   : > { %4762 = vmatmul.mubr.msk.f32.vlgmr.msra.gmra.mxu0 %vm1219_vm2, %v2395_v32 }
 0xb28   : > { %4794 = vmatpush3.xpose.msk.msra.mxu0 %vm1219_vm2, %v5814_v17  ;;  %v4744_v33 = vpop.f32.mrf.mxu0  ;;  %4795 = vmatprep.mubr.msk.f32.mxu0 %vm5159_vm1, %v5158_v4 }
 0xb29   : > { %4798 = vmatprep.subr.mxu0 %v5158_v4 }
 0xb2b   : > { %4796 = vmatmul.mubr.msk.f32.vlgmr.msra.gmra.mxu0 %vm1219_vm2, %v5879_v12  ;;  %v5989_v12 = vadd.f32 %v5441_v50, %v460_v11 }
 0xb2c   : > { %4799 = vmatpush3.msra.mxu0 %v5462_v58  ;;  %4800 = vmatprep.mubr.msk.f32.mxu0 %vm5159_vm1, %v5158_v4 }
 0xb2d   : > { %4803 = vmatprep.subr.mxu0 %v5158_v4 }
 0xbc1   : > { %v2649_v34 = vpop.f32.mrf.mxu1 }
 0xbc2   : > { %4791 = vmatmul.mubr.msk.f32.vlgmr.msra.gmra.mxu1 %vm1219_vm2, %v2649_v34  ;;  %v3164_v34 = vld [vmem:[%s6375_s6 + $0x1f8] sm:$0xff] }
 0xbc3   : > { %4823 = vmatpush3.xpose.msk.msra.mxu1 %vm1219_vm2, %v2988_v35  ;;  %v4773_v17 = vpop.f32.mrf.mxu1  ;;  %4824 = vmatprep.mubr.msk.f32.mxu1 %vm5159_vm1, %v5158_v4  ;;  %v3163_v35 = vld [vmem:[%s6375_s6 + $0x1f0] sm:$0xff] }
 0xbc4   : > { %4827 = vmatprep.subr.mxu1 %v5158_v4  ;;  %v3162_v17 = vld [vmem:[%s6375_s6 + $0x1e8] sm:$0xff] }
 0xbc6   : > { %4825 = vmatmul.mubr.msk.f32.vlgmr.msra.gmra.mxu1 %vm1219_vm2, %v2986_v36  ;;  %v3161_v36 = vld [vmem:[%s6375_s6 + $0x1e0] sm:$0xff] }
 0xbc7   : > { %4829 = vmatprep.mubr.msk.f32.mxu1 %vm5159_vm1, %v5158_v4 }
 0xbe7   : > { %v2476_v37 = vpop.f32.mrf.mxu0 }
 0xbe8   : > { %v2480_v38 = vadd.f32 %v2476_v37, %v5862_v40  ;;  %v3160_v37 = vld [vmem:[%s6375_s6 + $0x1d8] sm:$0xff] }
 0xbe9   : > { %v4763_v41 = vpop.f32.mrf.mxu0 }
 0xbea   : > { %v3158_v41 = vld [vmem:[%s6375_s6 + $0x1c8] sm:$0xff] }
 0xbeb   : > { %v2809_v42 = vpop.f32.mrf.mxu0 }
 0xbec   : > { %v2813_v46 = vmul.f32 %v5542_v21, %v2809_v42  ;;  %v3157_v42 = vld [vmem:[%s6375_s6 + $0x1c0] sm:$0xff] }
 0xbed   : > { %v4797_v56 = vpop.f32.mrf.mxu0 }
 0xbee   : > { %v2814_v60 = vsel %vm1303_vm3, %v2813_v46, -inf }
 0xbef   : > { %2815 = vmax.xlane.f32.xlu0 %v2814_v60 }
 0xc78   : > { %v2816_v0 = vpop.xlane.xlu0 %2815 }
 0xc79   : > { %v2817_v2 = vsub.f32 %v2813_v46, %v2816_v0  ;;  %v6084_v46 = vld [vmem:[%s6374_s5 + $0x8] sm:$0xf] }
 0xc7a   : > { %v484_v56 = vrot.slane %v6084_v46, %v5772_v39 }
 0xc7b   : > { %v2818_v44 = vmul.f32 1.442695, %v2817_v2 }
 0xc7c   : > { %v927_v2 = vadd.f32 %v5689_v47, %v484_v56  ;;  %v3667_v56 = vld [vmem:[%s6375_s6 + $0x270] sm:$0xff] }
 0xc7d   : > { %5049 = vpow2.f32 %v2818_v44 }
 0xc82   : > { %v2730_v51 = vpop.f32.mrf.mxu1 }
 0xc83   : > { %v5975_v54 = vadd.f32 %v2730_v51, %v2480_v38  ;;  %v3159_v38 = vld [vmem:[%s6375_s6 + $0x1d0] sm:$0xff] }
 0xc84   : > { %v4792_v55 = vpop.f32.mrf.mxu1 }
 0xc86   : > { %v3059_v59 = vpop.f32.mrf.mxu1 }
 0xc87   : > { %v3063_v3 = vmul.f32 %v5542_v21, %v3059_v59 }
 0xc88   : > { %v4826_v40 = vpop.f32.mrf.mxu1 }
 0xc89   : > { %v3064_v5 = vsel %vm1303_vm3, %v3063_v3, -inf }
 0xc8a   : > { %v5050_v6 = vpop.eup %5049  ;;  %3065 = vmax.xlane.f32.xlu1 %v3064_v5  ;;  %v6110_v5 = vld [vmem:[%s5537_s12] ss:$0 sm:$0xff] }
 0xc8b   : > { %v2820_v7 = vmul.f32 %v5050_v6, %v5542_v21 }
 0xc8d   : > { %v2821_v8 = vsel %vm1303_vm3, %v2820_v7, 0.0 }
 0xc8e   : > { %2822 = vadd.xlane.f32.xlu0 %v2821_v8 }
 0xc9b   : > { %3491 = vrot.lane.b32.xlu1 %v5989_v12, %s6390_s24 }
 0xd13   : > { %v3066_v13 = vpop.xlane.xlu1 %3065 }
 0xd14   : > { %v3067_v9 = vsub.f32 %v3063_v3, %v3066_v13 }
 0xd16   : > { %v3068_v57 = vmul.f32 1.442695, %v3067_v9 }
 0xd17   : > { %v2823_v61 = vpop.xlane.xlu0 %2822  ;;  %v3492_v44 = vpop.permute.xlu1 %3491 }
 0xd18   : > { %5051 = vpow2.f32 %v3068_v57  ;;  %vm2824_vm10 = vcmp.eq.f32.partialorder %v2823_v61, 0.0 }
 0xd19   : > { %v4428_v1 = vsel %vm2824_vm10, 1.0, %v5158_v4 }
 0xd1a   : > { %v2827_v14 = vadd.f32 %v4428_v1, %v2823_v61 }
 0xd1c   : > { %5053 = vrcp.f32 %v2827_v14 }
 0xd25   : > { %v5052_v18 = vpop.eup %5051 }
 0xd26   : > { %v3070_v16 = vmul.f32 %v5052_v18, %v5542_v21  ;;  %v6008_v21 = vadd.f32 %v5528_v19, %v989_v23  ;;  %v2907_v19 = vld [vmem:[%s6375_s6 + $0x1a0] sm:$0xff] }
 0xd28   : > { %v3071_v52 = vsel %vm1303_vm3, %v3070_v16, 0.0 }
 0xd29   : > { %v5054_v50 = vpop.eup %5053  ;;  %3072 = vadd.xlane.f32.xlu0 %v3071_v52 }
 0xd2a   : > { %v2829_v10 = vmul.f32 %v5054_v50, %v2820_v7 }
 0xd2c   : > { %4801 = vmatmul.mubr.msk.f32.vlgmr.msra.gmra.mxu0 %vm1303_vm3, %v2829_v10 }
 0xd2d   : > { %4819 = vmatprep.mubr.msk.f32.mxu0 %vm5159_vm1, %v5158_v4  ;;  %4804 = vmatpush3.msra.mxu0 %v2910_v24 }
 0xd2e   : > { %4805 = vmatprep.subr.mxu0 %v5158_v4 }
 0xd2f   : > { %4806 = vmatpush3.msra.mxu0 %v2909_v25 }
 0xd30   : > { %4807 = vmatprep.subr.mxu0 %v5158_v4 }
 0xd3f   : > { %3081 = vrot.lane.b32.xlu0 %v5462_v58, %s6390_s24  ;;  %v2908_v58 = vld [vmem:[%s6375_s6 + $0x1a8] sm:$0xff] }
 0xd40   : > { %4808 = vmatpush3.msra.mxu0 %v2908_v58 }
 0xd41   : > { %4809 = vmatprep.subr.mxu0 %v5158_v4 }
 0xd42   : > { %4810 = vmatpush3.msra.mxu0 %v2907_v19 }
 0xd43   : > { %3489 = vrot.lane.b32.xlu0 %v6008_v21, %s6390_s24  ;;  %4811 = vmatprep.subr.mxu0 %v5158_v4 }
 0xd44   : > { %4812 = vmatpush3.msra.mxu0 %v2906_v45 }
 0xd45   : > { %4813 = vmatprep.subr.mxu0 %v5158_v4 }
 0xd46   : > { %4814 = vmatpush3.msra.mxu0 %v2905_v63 }
 0xd47   : > { %4815 = vmatprep.subr.mxu0 %v5158_v4 }
 0xd48   : > { %4816 = vmatpush3.msra.mxu0 %v2904_v26 }
 0xd49   : > { %4817 = vmatprep.subr.mxu0 %v5158_v4 }
 0xd4a   : > { %4818 = vmatpush3.msra.mxu0 %v2903_v27 }
 0xd4b   : > { %4851 = vmatprep.subr.mxu0 %v5158_v4 }
 0xdb2   : > { %v3073_v28 = vpop.xlane.xlu0 %3072 }
 0xdb3   : > { %vm3074_vm11 = vcmp.eq.f32.partialorder %v3073_v28, 0.0 }
 0xdb4   : > { %v4433_v29 = vsel %vm3074_vm11, 1.0, %v5158_v4 }
 0xdb5   : > { %v3077_v30 = vadd.f32 %v4433_v29, %v3073_v28  ;;  %v463_v28 = vsub.s32 5, %v5424_v43  ;;  %v3414_v43 = vld [vmem:[%s6375_s6 + $0x238] sm:$0xff] }
 0xdb6   : > { %v3082_v31 = vpop.permute.xlu0 %3081 }
 0xdb7   : > { %5055 = vrcp.f32 %v3077_v30  ;;  %4828 = vmatpush3.msra.mxu1 %v3082_v31  ;;  %v464_v29 = vrot.slane %v5985_v49, %v463_v28  ;;  %v993_v31 = vrot.slane %v6002_v22, %v463_v28  ;;  %v3412_v49 = vld [vmem:[%s6375_s6 + $0x228] sm:$0xff]  ;;  %v3410_v22 = vld [vmem:[%s6375_s6 + $0x218] sm:$0xff] }
 0xdb8   : > { %4832 = vmatprep.subr.mxu1 %v5158_v4 }
 0xdb9   : > { %v6131_v30 = vadd.f32 %v5451_v53, %v464_v29  ;;  %v3413_v53 = vld [vmem:[%s6375_s6 + $0x230] sm:$0xff] }
 0xdba   : > { %v3490_v47 = vpop.permute.xlu0 %3489 }
 0xdc4   : > { %v5056_v32 = vpop.eup %5055 }
 0xdc5   : > { %v3079_v33 = vmul.f32 %v5056_v32, %v3070_v16  ;;  %v6137_v32 = vadd.f32 %v5539_v20, %v993_v31  ;;  %v3411_v20 = vld [vmem:[%s6375_s6 + $0x220] sm:$0xff] }
 0xdc7   : > { %4830 = vmatmul.mubr.msk.f32.vlgmr.msra.gmra.mxu1 %vm1303_vm3, %v3079_v33  ;;  %v3409_v33 = vld [vmem:[%s6375_s6 + $0x210] sm:$0xff] }
 0xdc8   : > { %4833 = vmatpush3.msra.mxu1 %v3164_v34  ;;  %4848 = vmatprep.mubr.msk.f32.mxu1 %vm5159_vm1, %v5158_v4  ;;  %v3408_v34 = vld [vmem:[%s6375_s6 + $0x208] sm:$0xff] }
 0xdc9   : > { %4834 = vmatprep.subr.mxu1 %v5158_v4 }
 0xdca   : > { %4835 = vmatpush3.msra.mxu1 %v3163_v35  ;;  %v3407_v35 = vld [vmem:[%s6375_s6 + $0x200] sm:$0xff] }
 0xdcb   : > { %4836 = vmatprep.subr.mxu1 %v5158_v4 }
 0xdcc   : > { %4837 = vmatpush3.msra.mxu1 %v3162_v17 }
 0xdcd   : > { %4838 = vmatprep.subr.mxu1 %v5158_v4 }
 0xdce   : > { %4839 = vmatpush3.msra.mxu1 %v3161_v36 }
 0xdcf   : > { %4840 = vmatprep.subr.mxu1 %v5158_v4 }
 0xdd0   : > { %4841 = vmatpush3.msra.mxu1 %v3160_v37 }
 0xdd1   : > { %4842 = vmatprep.subr.mxu1 %v5158_v4 }
 0xdd2   : > { %4843 = vmatpush3.msra.mxu1 %v3159_v38 }
 0xdd3   : > { %4844 = vmatprep.subr.mxu1 %v5158_v4 }
 0xdd4   : > { %4845 = vmatpush3.msra.mxu1 %v3158_v41 }
 0xdd5   : > { %4846 = vmatprep.subr.mxu1 %v5158_v4 }
 0xdd6   : > { %4847 = vmatpush3.msra.mxu1 %v3157_v42  ;;  %v3668_v42 = vld [vmem:[%s6375_s6 + $0x278] sm:$0xff] }
 0xdd7   : > { %4880 = vmatprep.subr.mxu1 %v5158_v4 }
 0xdec   : > { %v2899_v60 = vpop.f32.mrf.mxu0 }
 0xded   : > { %4820 = vmatmul.mubr.msk.f32.vlgmr.msra.gmra.mxu0 %vm1219_vm2, %v2899_v60  ;;  %v3666_v60 = vld [vmem:[%s6375_s6 + $0x268] sm:$0xff] }
 0xdee   : > { %4852 = vmatpush3.xpose.msk.msra.mxu0 %vm1219_vm2, %v5989_v12  ;;  %v4802_v0 = vpop.f32.mrf.mxu0  ;;  %4853 = vmatprep.mubr.msk.f32.mxu0 %vm5159_vm1, %v5158_v4 }
 0xdef   : > { %4856 = vmatprep.subr.mxu0 %v5158_v4  ;;  %v3665_v0 = vld [vmem:[%s6375_s6 + $0x260] sm:$0xff] }
 0xdf1   : > { %4854 = vmatmul.mubr.msk.f32.vlgmr.msra.gmra.mxu0 %vm1219_vm2, %v6008_v21 }
 0xdf2   : > { %4857 = vmatpush3.msra.mxu0 %v927_v2  ;;  %4858 = vmatprep.mubr.msk.f32.mxu0 %vm5159_vm1, %v5158_v4 }
 0xdf3   : > { %4861 = vmatprep.subr.mxu0 %v5158_v4 }
 0xe87   : > { %v3153_v39 = vpop.f32.mrf.mxu1 }
 0xe88   : > { %4849 = vmatmul.mubr.msk.f32.vlgmr.msra.gmra.mxu1 %vm1219_vm2, %v3153_v39  ;;  %v3663_v39 = vld [vmem:[%s6375_s6 + $0x250] sm:$0xff] }
 0xe89   : > { %4881 = vmatpush3.xpose.msk.msra.mxu1 %vm1219_vm2, %v3492_v44  ;;  %v4831_v51 = vpop.f32.mrf.mxu1  ;;  %4882 = vmatprep.mubr.msk.f32.mxu1 %vm5159_vm1, %v5158_v4  ;;  %v3662_v44 = vld [vmem:[%s6375_s6 + $0x248] sm:$0xff] }
 0xe8a   : > { %4885 = vmatprep.subr.mxu1 %v5158_v4  ;;  %v3661_v51 = vld [vmem:[%s6375_s6 + $0x240] sm:$0xff] }
 0xe8c   : > { %4883 = vmatmul.mubr.msk.f32.vlgmr.msra.gmra.mxu1 %vm1219_vm2, %v3490_v47  ;;  %v488_v47 = vrot.slane %v6084_v46, %v5809_v15 }
 0xe8d   : > { %4887 = vmatprep.mubr.msk.f32.mxu1 %vm5159_vm1, %v5158_v4 }
 0xead   : > { %v2980_v55 = vpop.f32.mrf.mxu0 }
 0xeae   : > { %v2984_v59 = vadd.f32 %v2980_v55, %v5975_v54 }
 0xeaf   : > { %v4821_v3 = vpop.f32.mrf.mxu0 }
 0xeb0   : > { %v929_v3 = vadd.f32 %v5691_v48, %v488_v47 }
 0xeb1   : > { %v3313_v40 = vpop.f32.mrf.mxu0 }
 0xeb2   : > { %v3317_v6 = vmul.f32 %v6110_v5, %v3313_v40 }
 0xeb3   : > { %v4855_v7 = vpop.f32.mrf.mxu0 }
 0xeb4   : > { %v3318_v8 = vsel %vm1303_vm3, %v3317_v6, -inf }
 0xeb5   : > { %3319 = vmax.xlane.f32.xlu1 %v3318_v8 }
 0xf3e   : > { %v3320_v62 = vpop.xlane.xlu1 %3319 }
 0xf3f   : > { %v3321_v11 = vsub.f32 %v3317_v6, %v3320_v62 }
 0xf41   : > { %v3322_v12 = vmul.f32 1.442695, %v3321_v11 }
 0xf43   : > { %5057 = vpow2.f32 %v3322_v12 }
 0xf48   : > { %v3234_v13 = vpop.f32.mrf.mxu1 }
 0xf49   : > { %v6114_v9 = vadd.f32 %v3234_v13, %v2984_v59 }
 0xf4a   : > { %v4850_v57 = vpop.f32.mrf.mxu1 }
 0xf4c   : > { %v3563_v61 = vpop.f32.mrf.mxu1 }
 0xf4d   : > { %v3567_v54 = vmul.f32 %v6110_v5, %v3563_v61 }
 0xf4e   : > { %v4884_v1 = vpop.f32.mrf.mxu1 }
 0xf4f   : > { %v3568_v14 = vsel %vm1303_vm3, %v3567_v54, -inf }
 0xf50   : > { %v5058_v18 = vpop.eup %5057  ;;  %3569 = vmax.xlane.f32.xlu0 %v3568_v14 }
 0xf51   : > { %v3324_v16 = vmul.f32 %v6110_v5, %v5058_v18 }
 0xf53   : > { %v3325_v52 = vsel %vm1303_vm3, %v3324_v16, 0.0 }
 0xf54   : > { %3326 = vadd.xlane.f32.xlu0 %v3325_v52 }
 0xf6a   : > { %3585 = vrot.lane.b32.xlu0 %v927_v2, %s6390_s24  ;;  %v3664_v2 = vld [vmem:[%s6375_s6 + $0x258] sm:$0xff] }
 0xfd9   : > { %v3570_v50 = vpop.xlane.xlu0 %3569 }
 0xfda   : > { %v3571_v10 = vsub.f32 %v3567_v54, %v3570_v50 }
 0xfdc   : > { %v3572_v23 = vmul.f32 1.442695, %v3571_v10 }
 0xfdd   : > { %v3327_v21 = vpop.xlane.xlu0 %3326 }
 0xfde   : > { %5059 = vpow2.f32 %v3572_v23  ;;  %vm3328_vm12 = vcmp.eq.f32.partialorder %v3327_v21, 0.0 }
 0xfdf   : > { %v4438_v24 = vsel %vm3328_vm12, 1.0, %v5158_v4 }
 0xfe0   : > { %v3331_v25 = vadd.f32 %v4438_v24, %v3327_v21 }
 0xfe1   : > { %v3586_v58 = vpop.permute.xlu0 %3585 }
 0xfe2   : > { %5061 = vrcp.f32 %v3331_v25  ;;  %4886 = vmatpush3.msra.mxu1 %v3586_v58 }
 0xfe3   : > { %4890 = vmatprep.subr.mxu1 %v5158_v4 }
 0xfeb   : > { %v5060_v19 = vpop.eup %5059 }
 0xfec   : > { %v3574_v45 = vmul.f32 %v6110_v5, %v5060_v19 }
 0xfee   : > { %v3575_v63 = vsel %vm1303_vm3, %v3574_v45, 0.0 }
 0xfef   : > { %v5062_v26 = vpop.eup %5061  ;;  %3576 = vadd.xlane.f32.xlu1 %v3575_v63 }
 0xff0   : > { %v3333_v27 = vmul.f32 %v5062_v26, %v3324_v16 }
 0xff2   : > { %4859 = vmatmul.mubr.msk.f32.vlgmr.msra.gmra.mxu0 %vm1303_vm3, %v3333_v27 }
 0xff3   : > { %4877 = vmatprep.mubr.msk.f32.mxu0 %vm5159_vm1, %v5158_v4  ;;  %4862 = vmatpush3.msra.mxu0 %v3414_v43  ;;  %v3917_v43 = vld [vmem:[%s6375_s6 + $0x2b0] sm:$0xff] }
 0xff4   : > { %4863 = vmatprep.subr.mxu0 %v5158_v4 }
 0xff5   : > { %4864 = vmatpush3.msra.mxu0 %v3413_v53  ;;  %v3915_v53 = vld [vmem:[%s6375_s6 + $0x2a0] sm:$0xff] }
 0xff6   : > { %4865 = vmatprep.subr.mxu0 %v5158_v4 }
 0xff7   : > { %4866 = vmatpush3.msra.mxu0 %v3412_v49  ;;  %v3914_v49 = vld [vmem:[%s6375_s6 + $0x298] sm:$0xff] }
 0xff8   : > { %4867 = vmatprep.subr.mxu0 %v5158_v4 }
 0xff9   : > { %4868 = vmatpush3.msra.mxu0 %v3411_v20  ;;  %v3913_v20 = vld [vmem:[%s6375_s6 + $0x290] sm:$0xff] }
 0xffa   : > { %4869 = vmatprep.subr.mxu0 %v5158_v4 }
 0xffb   : > { %4870 = vmatpush3.msra.mxu0 %v3410_v22  ;;  %v3912_v22 = vld [vmem:[%s6375_s6 + $0x288] sm:$0xff] }
 0xffc   : > { %4871 = vmatprep.subr.mxu0 %v5158_v4 }
 0xffd   : > { %4872 = vmatpush3.msra.mxu0 %v3409_v33  ;;  %v3911_v33 = vld [vmem:[%s6375_s6 + $0x280] sm:$0xff] }
 0xffe   : > { %4873 = vmatprep.subr.mxu0 %v5158_v4 }
 0xfff   : > { %4874 = vmatpush3.msra.mxu0 %v3408_v34 }
0x1000   : > { %3995 = vrot.lane.b32.xlu1 %v6131_v30, %s6390_s24  ;;  %4875 = vmatprep.subr.mxu0 %v5158_v4 }
0x1001   : > { %4876 = vmatpush3.msra.mxu0 %v3407_v35 }
0x1002   : > { %4909 = vmatprep.subr.mxu0 %v5158_v4 }
0x1004   : > { %3993 = vrot.lane.b32.xlu1 %v6137_v32, %s6390_s24 }
0x1078   : > { %v3577_v17 = vpop.xlane.xlu1 %3576 }
0x1079   : > { %vm3578_vm13 = vcmp.eq.f32.partialorder %v3577_v17, 0.0 }
0x107a   : > { %v4443_v36 = vsel %vm3578_vm13, 1.0, %v5158_v4 }
0x107b   : > { %v3581_v37 = vadd.f32 %v4443_v36, %v3577_v17 }
0x107c   : > { %v3996_v15 = vpop.permute.xlu1 %3995 }
0x107d   : > { %5063 = vrcp.f32 %v3581_v37 }
0x1080   : > { %v3994_v48 = vpop.permute.xlu1 %3993 }
0x108a   : > { %v5064_v38 = vpop.eup %5063 }
0x108b   : > { %v3583_v41 = vmul.f32 %v5064_v38, %v3574_v45  ;;  %v4172_v38 = vld [vmem:[%s6375_s6 + $0x2f8] sm:$0xff] }
0x108d   : > { %4888 = vmatmul.mubr.msk.f32.vlgmr.msra.gmra.mxu1 %vm1303_vm3, %v3583_v41  ;;  %v4171_v41 = vld [vmem:[%s6375_s6 + $0x2f0] sm:$0xff] }
0x108e   : > { %4891 = vmatpush3.msra.mxu1 %v3668_v42  ;;  %4906 = vmatprep.mubr.msk.f32.mxu1 %vm5159_vm1, %v5158_v4  ;;  %v4170_v42 = vld [vmem:[%s6375_s6 + $0x2e8] sm:$0xff] }
0x108f   : > { %4892 = vmatprep.subr.mxu1 %v5158_v4 }
0x1090   : > { %4893 = vmatpush3.msra.mxu1 %v3667_v56  ;;  %v4169_v56 = vld [vmem:[%s6375_s6 + $0x2e0] sm:$0xff] }
0x1091   : > { %4894 = vmatprep.subr.mxu1 %v5158_v4 }
0x1092   : > { %4895 = vmatpush3.msra.mxu1 %v3666_v60  ;;  %v4168_v60 = vld [vmem:[%s6375_s6 + $0x2d8] sm:$0xff] }
0x1093   : > { %4896 = vmatprep.subr.mxu1 %v5158_v4 }
0x1094   : > { %4897 = vmatpush3.msra.mxu1 %v3665_v0  ;;  %v4167_v0 = vld [vmem:[%s6375_s6 + $0x2d0] sm:$0xff] }
0x1095   : > { %4898 = vmatprep.subr.mxu1 %v5158_v4 }
0x1096   : > { %4899 = vmatpush3.msra.mxu1 %v3664_v2  ;;  %v4166_v2 = vld [vmem:[%s6375_s6 + $0x2c8] sm:$0xff] }
0x1097   : > { %4900 = vmatprep.subr.mxu1 %v5158_v4 }
0x1098   : > { %4901 = vmatpush3.msra.mxu1 %v3663_v39 }
0x1099   : > { %4902 = vmatprep.subr.mxu1 %v5158_v4 }
0x109a   : > { %4903 = vmatpush3.msra.mxu1 %v3662_v44 }
0x109b   : > { %4904 = vmatprep.subr.mxu1 %v5158_v4 }
0x109c   : > { %4905 = vmatpush3.msra.mxu1 %v3661_v51  ;;  %v4165_v51 = vld [vmem:[%s6375_s6 + $0x2c0] sm:$0xff] }
0x109d   : > { %4938 = vmatprep.subr.mxu1 %v5158_v4 }
0x10b2   : > { %v3403_v55 = vpop.f32.mrf.mxu0 }
0x10b3   : > { %4878 = vmatmul.mubr.msk.f32.vlgmr.msra.gmra.mxu0 %vm1219_vm2, %v3403_v55 }
0x10b4   : > { %4910 = vmatpush3.xpose.msk.msra.mxu0 %vm1219_vm2, %v6131_v30  ;;  %v4860_v59 = vpop.f32.mrf.mxu0  ;;  %4911 = vmatprep.mubr.msk.f32.mxu0 %vm5159_vm1, %v5158_v4 }
0x10b5   : > { %4914 = vmatprep.subr.mxu0 %v5158_v4 }
0x10b7   : > { %4912 = vmatmul.mubr.msk.f32.vlgmr.msra.gmra.mxu0 %vm1219_vm2, %v6137_v32  ;;  %v3918_v32 = vld [vmem:[%s6375_s6 + $0x2b8] sm:$0xff] }
0x10b8   : > { %4915 = vmatpush3.msra.mxu0 %v929_v3  ;;  %4916 = vmatprep.mubr.msk.f32.mxu0 %vm5159_vm1, %v5158_v4 }
0x10b9   : > { %4919 = vmatprep.subr.mxu0 %v5158_v4 }
0x114d   : > { %v3657_v46 = vpop.f32.mrf.mxu1 }
0x114e   : > { %4907 = vmatmul.mubr.msk.f32.vlgmr.msra.gmra.mxu1 %vm1219_vm2, %v3657_v46 }
0x114f   : > { %4939 = vmatpush3.xpose.msk.msra.mxu1 %vm1219_vm2, %v3996_v15  ;;  %v4889_v40 = vpop.f32.mrf.mxu1  ;;  %4940 = vmatprep.mubr.msk.f32.mxu1 %vm5159_vm1, %v5158_v4 }
0x1150   : > { %4943 = vmatprep.subr.mxu1 %v5158_v4 }
0x1152   : > { %4941 = vmatmul.mubr.msk.f32.vlgmr.msra.gmra.mxu1 %vm1219_vm2, %v3994_v48 }
0x1153   : > { %4945 = vmatprep.mubr.msk.f32.mxu1 %vm5159_vm1, %v5158_v4 }
0x1173   : > { %v3484_v6 = vpop.f32.mrf.mxu0 }
0x1174   : > { %v3488_v7 = vadd.f32 %v3484_v6, %v6114_v9 }
0x1175   : > { %v4879_v8 = vpop.f32.mrf.mxu0 }
0x1177   : > { %v3817_v62 = vpop.f32.mrf.mxu0 }
0x1178   : > { %v3821_v11 = vmul.f32 %v6110_v5, %v3817_v62 }
0x1179   : > { %v4913_v12 = vpop.f32.mrf.mxu0 }
0x117a   : > { %v3822_v13 = vsel %vm1303_vm3, %v3821_v11, -inf }
0x117b   : > { %3823 = vmax.xlane.f32.xlu0 %v3822_v13 }
0x1204   : > { %v3824_v57 = vpop.xlane.xlu0 %3823 }
0x1205   : > { %v3825_v61 = vsub.f32 %v3821_v11, %v3824_v57 }
0x1207   : > { %v3826_v54 = vmul.f32 1.442695, %v3825_v61 }
0x1209   : > { %5065 = vpow2.f32 %v3826_v54 }
0x120e   : > { %v3738_v1 = vpop.f32.mrf.mxu1 }
0x120f   : > { %v6234_v14 = vadd.f32 %v3738_v1, %v3488_v7  ;;  %v5079_v7 = vld [vmem:[%s5306_s21] sm:$0xff]  ;;  %s5080_s21 = scalar_lea.vmem %s4303_s27, 128 }
0x1210   : > { %v4908_v18 = vpop.f32.mrf.mxu1  ;;  %p5081_p12 = scmp.ne.s32.totalorder %s4303_s27, %s5080_s21  ;;  %p5088_p2 = scmp.lt.s32.totalorder %s5086_s16, %s5080_s21 }
0x1212   : > { %v4067_v16 = vpop.f32.mrf.mxu1  ;;  %p5082_p13 = pnand %p5081_p12, %p5257_p4  ;;  %p5089_p3 = por %p5088_p2, %p5087_p1 }
0x1213   : > { %v4071_v52 = vmul.f32 %v6110_v5, %v4067_v16  ;;  %v4457_v16 = vld [vmem:[%s6377_s8] ss:$0 sm:$0xff] }
0x1214   : > { %v4942_v9 = vpop.f32.mrf.mxu1  ;;  %p5083_p0 = pneg %p5082_p13 }
0x1215   : > { %v4072_v50 = vsel %vm1303_vm3, %v4071_v52, -inf  ;;  %v4458_v9 = vld [vmem:[%s6378_s9] ss:$0 sm:$0xff] }
0x1216   : > { %v5066_v10 = vpop.eup %5065  ;;  %4073 = vmax.xlane.f32.xlu1 %v4072_v50  ;;  %p5090_p5 = pnand %p5089_p3, %p5083_p0 }
0x1217   : > { %v3828_v23 = vmul.f32 %v6110_v5, %v5066_v10 }
0x1219   : > { %v3829_v21 = vsel %vm1303_vm3, %v3828_v23, 0.0 }
0x121a   : > { %3830 = vadd.xlane.f32.xlu0 %v3829_v21 }
0x1227   : > { %4089 = vrot.lane.b32.xlu1 %v929_v3, %s6390_s24  ;;  %s4300_s24 = scalar_lea.hbm %s6379_s10, %s4460_s19 }
0x129f   : > { %v4074_v24 = vpop.xlane.xlu1 %4073 }
0x12a0   : > { %v4075_v25 = vsub.f32 %v4071_v52, %v4074_v24 }
0x12a2   : > { %v4076_v58 = vmul.f32 1.442695, %v4075_v25 }
0x12a3   : > { %v4090_v19 = vpop.permute.xlu1 %4089  ;;  %v3831_v45 = vpop.xlane.xlu0 %3830 }
0x12a4   : > { %5067 = vpow2.f32 %v4076_v58  ;;  %vm3832_vm14 = vcmp.eq.f32.partialorder %v3831_v45, 0.0  ;;  %4944 = vmatpush3.msra.mxu1 %v4090_v19 }
0x12a5   : > { %v4448_v63 = vsel %vm3832_vm14, 1.0, %v5158_v4  ;;  %4948 = vmatprep.subr.mxu1 %v5158_v4 }
0x12a6   : > { %v3835_v26 = vadd.f32 %v4448_v63, %v3831_v45 }
0x12a8   : > { %5069 = vrcp.f32 %v3835_v26 }
0x12b1   : > { %v5068_v27 = vpop.eup %5067 }
0x12b2   : > { %v4078_v28 = vmul.f32 %v6110_v5, %v5068_v27  ;;  %v3916_v5 = vld [vmem:[%s6375_s6 + $0x2a8] sm:$0xff] }
0x12b4   : > { %v4079_v29 = vsel %vm1303_vm3, %v4078_v28, 0.0 }
0x12b5   : > { %v5070_v30 = vpop.eup %5069  ;;  %4080 = vadd.xlane.f32.xlu0 %v4079_v29 }
0x12b6   : > { %v3837_v31 = vmul.f32 %v5070_v30, %v3828_v23 }
0x12b8   : > { %4917 = vmatmul.mubr.msk.f32.vlgmr.msra.gmra.mxu0 %vm1303_vm3, %v3837_v31 }
0x12b9   : > { %4935 = vmatprep.mubr.msk.f32.mxu0 %vm5159_vm1, %v5158_v4  ;;  %4920 = vmatpush3.msra.mxu0 %v3918_v32 }
0x12ba   : > { %4921 = vmatprep.subr.mxu0 %v5158_v4 }
0x12bb   : > { %4922 = vmatpush3.msra.mxu0 %v3917_v43 }
0x12bc   : > { %4923 = vmatprep.subr.mxu0 %v5158_v4 }
0x12bd   : > { %4924 = vmatpush3.msra.mxu0 %v3916_v5 }
0x12be   : > { %4925 = vmatprep.subr.mxu0 %v5158_v4 }
0x12bf   : > { %4926 = vmatpush3.msra.mxu0 %v3915_v53 }
0x12c0   : > { %4927 = vmatprep.subr.mxu0 %v5158_v4 }
0x12c1   : > { %4928 = vmatpush3.msra.mxu0 %v3914_v49 }
0x12c2   : > { %4929 = vmatprep.subr.mxu0 %v5158_v4 }
0x12c3   : > { %4930 = vmatpush3.msra.mxu0 %v3913_v20 }
0x12c4   : > { %4931 = vmatprep.subr.mxu0 %v5158_v4 }
0x12c5   : > { %4932 = vmatpush3.msra.mxu0 %v3912_v22 }
0x12c6   : > { %4933 = vmatprep.subr.mxu0 %v5158_v4 }
0x12c7   : > { %4934 = vmatpush3.msra.mxu0 %v3911_v33 }
0x133e   : > { %v4081_v34 = vpop.xlane.xlu0 %4080 }
0x133f   : > { %vm4082_vm15 = vcmp.eq.f32.partialorder %v4081_v34, 0.0 }
0x1340   : > { %v4453_v35 = vsel %vm4082_vm15, 1.0, %v5158_v4 }
0x1341   : > { %v4085_v17 = vadd.f32 %v4453_v35, %v4081_v34 }
0x1343   : > { %5071 = vrcp.f32 %v4085_v17 }
0x1350   : > { %v5072_v36 = vpop.eup %5071 }
0x1351   : > { %v4087_v37 = vmul.f32 %v5072_v36, %v4078_v28 }
0x1353   : > { %4946 = vmatmul.mubr.msk.f32.vlgmr.msra.gmra.mxu1 %vm1303_vm3, %v4087_v37 }
0x1354   : > { %4949 = vmatpush3.msra.mxu1 %v4172_v38  ;;  %4964 = vmatprep.mubr.msk.f32.mxu1 %vm5159_vm1, %v5158_v4 }
0x1355   : > { %4950 = vmatprep.subr.mxu1 %v5158_v4 }
0x1356   : > { %4951 = vmatpush3.msra.mxu1 %v4171_v41 }
0x1357   : > { %4952 = vmatprep.subr.mxu1 %v5158_v4 }
0x1358   : > { %4953 = vmatpush3.msra.mxu1 %v4170_v42 }
0x1359   : > { %4954 = vmatprep.subr.mxu1 %v5158_v4 }
0x135a   : > { %4955 = vmatpush3.msra.mxu1 %v4169_v56 }
0x135b   : > { %4956 = vmatprep.subr.mxu1 %v5158_v4 }
0x135c   : > { %4957 = vmatpush3.msra.mxu1 %v4168_v60 }
0x135d   : > { %4958 = vmatprep.subr.mxu1 %v5158_v4 }
0x135e   : > { %4959 = vmatpush3.msra.mxu1 %v4167_v0 }
0x135f   : > { %4960 = vmatprep.subr.mxu1 %v5158_v4 }
0x1360   : > { %4961 = vmatpush3.msra.mxu1 %v4166_v2 }
0x1361   : > { %4962 = vmatprep.subr.mxu1 %v5158_v4  ;;  %v4456_v4 = vld [vmem:[%s6376_s7] ss:$0 sm:$0xff] }
0x1362   : > { %4963 = vmatpush3.msra.mxu1 %v4165_v51 }
0x1378   : > { %v3907_v39 = vpop.f32.mrf.mxu0 }
0x1379   : > { %4936 = vmatmul.mubr.msk.f32.vlgmr.msra.gmra.mxu0 %vm1219_vm2, %v3907_v39 }
0x137a   : > { %v4918_v44 = vpop.f32.mrf.mxu0 }
0x1413   : > { %v4161_v47 = vpop.f32.mrf.mxu1 }
0x1414   : > { %4965 = vmatmul.mubr.msk.f32.vlgmr.msra.gmra.mxu1 %vm1219_vm2, %v4161_v47 }
0x1415   : > { %v4947_v55 = vpop.f32.mrf.mxu1 }
0x1439   : > { %v3988_v59 = vpop.f32.mrf.mxu0 }
0x143a   : > { %v3992_v3 = vadd.f32 %v3988_v59, %v6234_v14 }
0x143b   : > { %v4937_v15 = vpop.f32.mrf.mxu0 }
0x14d4   : > { %v4242_v46 = vpop.f32.mrf.mxu1 }
0x14d5   : > { %v4246_v40 = vadd.f32 %v4242_v46, %v3992_v3 }
0x14d6   : > { %v4966_v48 = vpop.f32.mrf.mxu1 }
0x14d7   : > { %v4254_v6 = vadd.f32 %v4456_v4, %v4246_v40 }
0x14d9   : > { %v4255_v8 = vadd.f32 %v5079_v7, %v4254_v6 }
0x14db   : > { %v4256_v62 = vsel %vm501_vm0, %v4255_v8, 0.0 }
0x14dc   : > { %4257 = vadd.xlane.f32.xlu0 %v4256_v62 }
0x1565   : > { %v4258_v11 = vpop.xlane.xlu0 %4257 }
0x1566   : > { %v4260_v12 = vmul.f32 0.03125, %v4258_v11 }
0x1568   : > { %v4261_v13 = vsub.f32 %v4255_v8, %v4260_v12 }
0x156a   : > { %v4262_v57 = vmul.f32 %v4261_v13, %v4261_v13 }
0x156c   : > { %v4263_v61 = vsel %vm501_vm0, %v4262_v57, 0.0 }
0x156d   : > { %4264 = vadd.xlane.f32.xlu0 %v4263_v61 }
0x15f6   : > { %v4265_v54 = vpop.xlane.xlu0 %4264 }
0x15f7   : > { %v4266_v1 = vmul.f32 0.03125, %v4265_v54 }
0x15f9   : > { %v4267_v14 = vadd.f32 1e-05, %v4266_v1 }
0x15fb   : > { %5073 = vrsqrt.f32 %v4267_v14 }
0x1608   : > { %v5074_v18 = vpop.eup %5073 }
0x1609   : > { %v4269_v52 = vmul.f32 %v5074_v18, %v4261_v13 }
0x160b   : > { %v4277_v50 = vmul.f32 %v4457_v16, %v4269_v52 }
0x160d   : > { %v4285_v10 = vadd.f32 %v4458_v9, %v4277_v50 }
0x160f   : > { %4286 = vst.msk [vmem:[%s375_s20] sm:$0xff] %vm501_vm0, %v4285_v10 }
0x1610   : > { %5093 = shalt.err (!%p5090_p5)
}
0x1611   : > { %s5094_s0 = scalar_lea.hbm %s4300_s24, 128  ;;  %s5098_s19 = scalar_lea.hbm %s6379_s10, 256 }
0x1612   : > { %p5095_p6 = scmp.ne.s32.totalorder %s4300_s24, %s5094_s0  ;;  %p5099_p10 = scmp.lt.s32.totalorder %s4300_s24, %s6379_s10 }
0x1613   : > { %p5100_p11 = scmp.lt.s32.totalorder %s5098_s19, %s5094_s0 }
0x1614   : > { %p5096_p7 = pnand %p5095_p6, %p5257_p4 }
0x1615   : > { %p5101_p12 = por %p5100_p11, %p5099_p10 }
0x1616   : > { %p5097_p9 = pneg %p5096_p7 }
0x1618   : > { %p5102_p13 = pnand %p5101_p12, %p5097_p9 }
0x161a   : > { %5105 = shalt.err (!%p5102_p13)
}
0x161b   : > { %4967 = dma.vmem_to_hbm [thread:$0]  (%p5257_p4), %s4303_s27, 128, %s4300_s24, %s4288_s1  }
0x161c PF: > { %p4973_p0 = scmp.ge.s32.totalorder %s5156_s18, 2  ;;  %s4314_s22 = sand.u32 1, %s5136_s13  }
0x161d   : > { %s4315_s21 = scalar_lea.sflag [#allocation4], %s4314_s22 }
0x161e   : > { %p4970_p1 = pnand %p4973_p0, %p5264_p8 }
0x1620   : > { %p4971_p2 = pneg %p4970_p1 }
0x1622   : > { %5131 = dma.done.wait (%p4971_p2), %s4315_s21, 128  }
0x1623   : > { %5133 = vsyncadd (%p4971_p2), %s4315_s21, 4294967168  ;;  %s23_s18 = sadd.s32 1, %s5156_s18   ;;  %s6391_s1 = sld [smem:[#allocation6_spill]] }
0x1624   : > { %p20_p3 = scmp.ge.s32.totalorder %s23_s18, 4   ;;  %s6392_s13 = smov %s5140_s14 }
0x1625   : > { %s6393_s14 = smov %s5144_s15  ;;  %s6394_s15 = smov %s5270_s26 }
0x1626   : > { %s6395_s16 = smov %s5152_s17  ;;  %22 = sbr.rel (!%p20_p3) target bundleno = 7 (0x7), region = 102 }
0x1629   : > { %s6396_s17 = smov %s6391_s1 }
0x162b   :  { %4320 = vsyncpa [#allocation4], 1 }
0x162c   :  { %4322 = vsyncpa [#allocation4 + $0x1], 1 }

</bundles_post_ra>
